<compile_context>
chip_gen: v6e
topology: v6e:2x2x1
jax: 0.10.0
libtpu: 0.0.40
codegen_flags: <defaults>
</compile_context>

<pallas_src>
import math

import jax
import jax.numpy as jnp
from jax.experimental import pallas as pl
from jax.experimental.pallas import tpu as pltpu

# ----------------------------- small BERT config -----------------------------
VOCAB = 100
HIDDEN = 32
N_HEADS = 4
HEAD_DIM = HIDDEN // N_HEADS
INTERMEDIATE = 64
N_LAYERS = 2
MAX_POS = 16
TYPE_VOCAB = 2
EPS = 1e-12

B = 2
S = 8


# ------------------------------ in-kernel helpers ----------------------------
def _layer_norm(x, gamma, beta):
    # f32 VPU math (v5e has no bf16 VPU path).
    mu = jnp.mean(x, axis=-1, keepdims=True)
    var = jnp.mean((x - mu) ** 2, axis=-1, keepdims=True)
    return (x - mu) * jax.lax.rsqrt(var + EPS) * gamma + beta


def _gelu(x):
    # TODO(synk): HF "gelu" is erf-based; tanh approximation used for guaranteed
    # TPU lowering (difference is O(1e-4)).
    return 0.5 * x * (1.0 + jnp.tanh(0.7978845608028654 * (x + 0.044715 * x * x * x)))


# --------------------------------- fused kernel -------------------------------
def bert_kernel(emb_ref, mask_ref, eg_ref, eb_ref,
                wqkv_ref, bqkv_ref, wo_ref, bo_ref,
                g1_ref, b1_ref, wi_ref, bi_ref,
                wo2_ref, bo2_ref, g2_ref, b2_ref,
                cw_ref, cb_ref, out_ref):
    scale = 1.0 / math.sqrt(HEAD_DIM)

    # Embedding LayerNorm over the whole (B*S, H) slab (f32).
    x = _layer_norm(emb_ref[...], eg_ref[...], eb_ref[...])              # (B*S, H)

    # Additive attention bias from the (B, S) mask, built once (hoisted out of
    # the layer loop) in the head-batched (N_HEADS*B, 1, S) layout.
    bias = ((1.0 - mask_ref[...]) * -10000.0)[:, None, :]                # (B, 1, S)
    bias_nb = jnp.concatenate([bias] * N_HEADS, axis=0)                  # (NH*B, 1, S)

    for l in range(N_LAYERS):          # static layer loop; weights stay in VMEM
        wqkv = wqkv_ref[l]             # (H, 3H)  bf16, lane-packed [Q | K | V]
        bqkv = bqkv_ref[l]             # (1, 3H)  f32
        wo = wo_ref[l]                 # (H, H)   bf16 (standard head-concat layout)
        bo = bo_ref[l]                 # (1, H)   f32
        g1, b1 = g1_ref[l], b1_ref[l]
        wi, bi = wi_ref[l], bi_ref[l]
        wo2, bo2 = wo2_ref[l], bo2_ref[l]
        g2, b2 = g2_ref[l], b2_ref[l]

        # ---- fused QKV projection: ONE bf16 MXU matmul per layer ------------
        qkv = jnp.dot(x.astype(jnp.bfloat16), wqkv,
                      preferred_element_type=jnp.float32) + bqkv         # (B*S, 3H) f32
        qkv3 = qkv.reshape(B, S, 3 * HIDDEN)                             # leading-dim split

        # Head-batched Q/K/V: (NH*B, S, HD) via static lane slices + leading
        # concatenation (no broadcast of activations, no major-dim transposes).
        q = jnp.concatenate(
            [qkv3[:, :, h * HEAD_DIM:(h + 1) * HEAD_DIM]
             for h in range(N_HEADS)], axis=0).astype(jnp.bfloat16)
        k = jnp.concatenate(
            [qkv3[:, :, HIDDEN + h * HEAD_DIM:HIDDEN + (h + 1) * HEAD_DIM]
             for h in range(N_HEADS)], axis=0).astype(jnp.bfloat16)
        v = jnp.concatenate(
            [qkv3[:, :, 2 * HIDDEN + h * HEAD_DIM:2 * HIDDEN + (h + 1) * HEAD_DIM]
             for h in range(N_HEADS)], axis=0).astype(jnp.bfloat16)

        # ---- attention: one batched score einsum + one batched ctx einsum ---
        sc = jnp.einsum('nqd,nkd->nqk', q, k,
                        preferred_element_type=jnp.float32) * scale      # (NH*B, S, S)
        sc = sc + bias_nb

        m = jnp.max(sc, axis=-1, keepdims=True)                          # f32 softmax
        p = jnp.exp(sc - m)
        p = p * pl.reciprocal(jnp.sum(p, axis=-1, keepdims=True), approx=True)

        ctx = jnp.einsum('nqk,nkd->nqd', p.astype(jnp.bfloat16), v,
                         preferred_element_type=jnp.float32)             # (NH*B, S, HD)

        # Merge heads back onto the lane axis (standard concat-heads layout),
        # then ONE output projection matmul.
        ctx_m = jnp.concatenate([ctx[h * B:(h + 1) * B] for h in range(N_HEADS)],
                                axis=-1)                                 # (B, S, H)
        ctx_flat = ctx_m.reshape(B * S, HIDDEN)
        attn = jnp.dot(ctx_flat.astype(jnp.bfloat16), wo,
                       preferred_element_type=jnp.float32) + bo          # (B*S, H)

        h1 = _layer_norm(x + attn, g1, b1)

        # Feed-forward on the whole slab, bf16 MXU inputs, f32 accumulation.
        ff = _gelu(jnp.dot(h1.astype(jnp.bfloat16), wi,
                           preferred_element_type=jnp.float32) + bi)
        ff2 = jnp.dot(ff.astype(jnp.bfloat16), wo2,
                      preferred_element_type=jnp.float32) + bo2
        x = _layer_norm(h1 + ff2, g2, b2)

    # CLS token (row 0 of each batch element) -> 2-way dense head.
    cls = jnp.concatenate([x[b * S:b * S + 1] for b in range(B)], axis=0)  # (B, H)
    out_ref[...] = (jnp.dot(cls.astype(jnp.bfloat16), cw_ref[...],
                            preferred_element_type=jnp.float32) + cb_ref[...])


# --------------------------------- wrapper ------------------------------------
def pallas_bert(emb_flat, mask, p):
    return pl.pallas_call(
        bert_kernel,
        out_shape=jax.ShapeDtypeStruct((B, 2), jnp.float32),
        compiler_params=pltpu.CompilerParams(vmem_limit_bytes=64 * 1024 * 1024),
    )(emb_flat, mask,
      p["emb_ln_g"], p["emb_ln_b"],
      p["wqkv"], p["bqkv"], p["wo"], p["bo"],
      p["ln1_g"], p["ln1_b"], p["wi"], p["bi"],
      p["wo2"], p["bo2"], p["ln2_g"], p["ln2_b"],
      p["cls_w"], p["cls_b"])


# ------------------------------- parameter init -------------------------------
def init_params(key):
    std = 0.02
    keys = iter(jax.random.split(key, 64))

    def nrm(shape):
        return std * jax.random.normal(next(keys), shape, jnp.float32)

    wqkv, bqkv, wo, bo = [], [], [], []
    g1, b1, wi, bi, wo2, bo2, g2, b2 = [], [], [], [], [], [], [], []
    for _ in range(N_LAYERS):
        wq, wk, wv = nrm((HIDDEN, HIDDEN)), nrm((HIDDEN, HIDDEN)), nrm((HIDDEN, HIDDEN))
        # Lane-packed fused QKV weight: columns [Q heads | K heads | V heads],
        # each head HEAD_DIM wide (standard HF reshape order).
        wqkv.append(jnp.concatenate([wq, wk, wv], axis=1))               # (H, 3H)
        bqkv.append(jnp.zeros((1, 3 * HIDDEN), jnp.float32))
        wo.append(nrm((HIDDEN, HIDDEN)))                                 # consumes concat-heads
        bo.append(jnp.zeros((1, HIDDEN), jnp.float32))
        g1.append(jnp.ones((1, HIDDEN), jnp.float32))
        b1.append(jnp.zeros((1, HIDDEN), jnp.float32))
        wi.append(nrm((HIDDEN, INTERMEDIATE)))
        bi.append(jnp.zeros((1, INTERMEDIATE), jnp.float32))
        wo2.append(nrm((INTERMEDIATE, HIDDEN)))
        bo2.append(jnp.zeros((1, HIDDEN), jnp.float32))
        g2.append(jnp.ones((1, HIDDEN), jnp.float32))
        b2.append(jnp.zeros((1, HIDDEN), jnp.float32))

    bf16 = jnp.bfloat16
    return {
        "word_emb": nrm((VOCAB, HIDDEN)),
        "pos_emb": nrm((MAX_POS, HIDDEN)),
        "type_emb": nrm((TYPE_VOCAB, HIDDEN)),
        "emb_ln_g": jnp.ones((1, HIDDEN), jnp.float32),
        "emb_ln_b": jnp.zeros((1, HIDDEN), jnp.float32),
        # Matmul weights stored stacked per layer in bf16 (MXU-native inputs,
        # half the VMEM footprint); biases and LayerNorm params stay f32.
        "wqkv": jnp.stack(wqkv).astype(bf16), "bqkv": jnp.stack(bqkv),
        "wo": jnp.stack(wo).astype(bf16), "bo": jnp.stack(bo),
        "ln1_g": jnp.stack(g1), "ln1_b": jnp.stack(b1),
        "wi": jnp.stack(wi).astype(bf16), "bi": jnp.stack(bi),
        "wo2": jnp.stack(wo2).astype(bf16), "bo2": jnp.stack(bo2),
        "ln2_g": jnp.stack(g2), "ln2_b": jnp.stack(b2),
        "cls_w": nrm((HIDDEN, 2)).astype(bf16),
        "cls_b": jnp.zeros((1, 2), jnp.float32),
    }


# --------------------------------- forward -----------------------------------
@jax.jit
def bert_forward(params, input_ids, input_mask, segment_ids):
    # mirrors: output = self.bert(input_ids.squeeze(), input_mask.squeeze(), segment_ids.squeeze())
    ids = jnp.squeeze(input_ids, axis=1)                        # (B, S)
    mask = jnp.squeeze(input_mask, axis=1).astype(jnp.float32)  # (B, S)
    segs = jnp.squeeze(segment_ids, axis=1)                     # (B, S)
    b_, s_ = ids.shape

    # Embedding gathers (word/position/token-type) are plain-JAX glue
    # (data-dependent gather stays outside the kernel).
    emb = (jnp.take(params["word_emb"], ids, axis=0)
           + params["pos_emb"][None, :s_, :]
           + jnp.take(params["type_emb"], segs, axis=0))
    emb_flat = emb.reshape(b_ * s_, HIDDEN)

    batch_score = pallas_bert(emb_flat, mask, params)           # (B, 2)
    # matches .squeeze(-1) in the PyTorch head (no-op for an output dim of 2)
    return jnp.squeeze(batch_score, axis=-1) if batch_score.shape[-1] == 1 else batch_score


# ----------------------------------- main ------------------------------------
if __name__ == "__main__":
    key = jax.random.PRNGKey(0)
    k_param, k_ids = jax.random.split(key)

    params = init_params(k_param)

    input_ids = jax.random.randint(k_ids, (B, 1, S), 0, VOCAB, dtype=jnp.int32)
    # example attention mask: sample 0 fully attended, sample 1 has 3 padding tokens
    input_mask = jnp.array([[[1, 1, 1, 1, 1, 1, 1, 1]],
                            [[1, 1, 1, 1, 1, 0, 0, 0]]], dtype=jnp.int32)
    segment_ids = jnp.array([[[0, 0, 0, 0, 1, 1, 1, 1]],
                             [[0, 0, 0, 1, 1, 1, 1, 1]]], dtype=jnp.int32)

    batch_score = bert_forward(params, input_ids, input_mask, segment_ids)
    jax.block_until_ready(batch_score)
    assert batch_score.shape == (B, 2)
    assert bool(jnp.all(jnp.isfinite(batch_score)))
    print("KERNEL_OK")
</pallas_src>

<mosaic_0001>
module attributes {stable_mosaic.version = 11 : i64} {
  func.func @bert_kernel(%arg0: memref<16x32xf32, #tpu.memory_space<vmem>>, %arg1: memref<2x8xf32, #tpu.memory_space<vmem>>, %arg2: memref<1x32xf32, #tpu.memory_space<vmem>>, %arg3: memref<1x32xf32, #tpu.memory_space<vmem>>, %arg4: memref<2x32x96xbf16, #tpu.memory_space<vmem>>, %arg5: memref<2x1x96xf32, #tpu.memory_space<vmem>>, %arg6: memref<2x32x32xbf16, #tpu.memory_space<vmem>>, %arg7: memref<2x1x32xf32, #tpu.memory_space<vmem>>, %arg8: memref<2x1x32xf32, #tpu.memory_space<vmem>>, %arg9: memref<2x1x32xf32, #tpu.memory_space<vmem>>, %arg10: memref<2x32x64xbf16, #tpu.memory_space<vmem>>, %arg11: memref<2x1x64xf32, #tpu.memory_space<vmem>>, %arg12: memref<2x64x32xbf16, #tpu.memory_space<vmem>>, %arg13: memref<2x1x32xf32, #tpu.memory_space<vmem>>, %arg14: memref<2x1x32xf32, #tpu.memory_space<vmem>>, %arg15: memref<2x1x32xf32, #tpu.memory_space<vmem>>, %arg16: memref<32x2xbf16, #tpu.memory_space<vmem>>, %arg17: memref<1x2xf32, #tpu.memory_space<vmem>>, %arg18: memref<2x2xf32, #tpu.memory_space<vmem>>) attributes {dimension_semantics = [], scalar_prefetch = 0 : i64, scratch_operands = 0 : i64, tpu.core_type = #tpu.core_type<tc>} {
    %c0 = arith.constant 0 : index
    %c0_0 = arith.constant 0 : index
    %0 = vector.load %arg0[%c0, %c0_0] : memref<16x32xf32, #tpu.memory_space<vmem>>, vector<16x32xf32>
    %c0_1 = arith.constant 0 : index
    %c0_2 = arith.constant 0 : index
    %1 = vector.load %arg2[%c0_1, %c0_2] : memref<1x32xf32, #tpu.memory_space<vmem>>, vector<1x32xf32>
    %c0_3 = arith.constant 0 : index
    %c0_4 = arith.constant 0 : index
    %2 = vector.load %arg3[%c0_3, %c0_4] : memref<1x32xf32, #tpu.memory_space<vmem>>, vector<1x32xf32>
    %cst = arith.constant dense<0.000000e+00> : vector<16xf32>
    %3 = vector.multi_reduction <add>, %0, %cst [1] : vector<16x32xf32> to vector<16xf32>
    %4 = vector.shape_cast %3 : vector<16xf32> to vector<16x1xf32>
    %cst_5 = arith.constant 3.200000e+01 : f32
    %5 = vector.broadcast %cst_5 : f32 to vector<16x1xf32>
    %6 = arith.divf %4, %5 : vector<16x1xf32>
    %7 = vector.broadcast %6 : vector<16x1xf32> to vector<16x32xf32>
    %8 = arith.subf %0, %7 : vector<16x32xf32>
    %9 = arith.mulf %8, %8 : vector<16x32xf32>
    %cst_6 = arith.constant dense<0.000000e+00> : vector<16xf32>
    %10 = vector.multi_reduction <add>, %9, %cst_6 [1] : vector<16x32xf32> to vector<16xf32>
    %11 = vector.shape_cast %10 : vector<16xf32> to vector<16x1xf32>
    %cst_7 = arith.constant 3.200000e+01 : f32
    %12 = vector.broadcast %cst_7 : f32 to vector<16x1xf32>
    %13 = arith.divf %11, %12 : vector<16x1xf32>
    %14 = vector.broadcast %6 : vector<16x1xf32> to vector<16x32xf32>
    %15 = arith.subf %0, %14 : vector<16x32xf32>
    %cst_8 = arith.constant 9.99999996E-13 : f32
    %16 = vector.broadcast %cst_8 : f32 to vector<16x1xf32>
    %17 = arith.addf %13, %16 : vector<16x1xf32>
    %18 = math.rsqrt %17 : vector<16x1xf32>
    %19 = vector.broadcast %18 : vector<16x1xf32> to vector<16x32xf32>
    %20 = arith.mulf %15, %19 : vector<16x32xf32>
    %21 = vector.broadcast %1 : vector<1x32xf32> to vector<16x32xf32>
    %22 = arith.mulf %20, %21 : vector<16x32xf32>
    %23 = vector.broadcast %2 : vector<1x32xf32> to vector<16x32xf32>
    %24 = arith.addf %22, %23 : vector<16x32xf32>
    %c0_9 = arith.constant 0 : index
    %c0_10 = arith.constant 0 : index
    %25 = vector.load %arg1[%c0_9, %c0_10] : memref<2x8xf32, #tpu.memory_space<vmem>>, vector<2x8xf32>
    %cst_11 = arith.constant 1.000000e+00 : f32
    %26 = vector.broadcast %cst_11 : f32 to vector<2x8xf32>
    %27 = arith.subf %26, %25 : vector<2x8xf32>
    %cst_12 = arith.constant -1.000000e+04 : f32
    %28 = vector.broadcast %cst_12 : f32 to vector<2x8xf32>
    %29 = arith.mulf %27, %28 : vector<2x8xf32>
    %30 = vector.shape_cast %29 : vector<2x8xf32> to vector<2x1x8xf32>
    %31 = tpu.concatenate %30, %30, %30, %30 in 0 : vector<2x1x8xf32>, vector<2x1x8xf32>, vector<2x1x8xf32>, vector<2x1x8xf32> -> vector<8x1x8xf32>
    %c0_13 = arith.constant 0 : index
    %c0_14 = arith.constant 0 : index
    %c0_15 = arith.constant 0 : index
    %32 = vector.load %arg4[%c0_13, %c0_14, %c0_15] : memref<2x32x96xbf16, #tpu.memory_space<vmem>>, vector<1x32x96xbf16>
    %33 = vector.shape_cast %32 : vector<1x32x96xbf16> to vector<32x96xbf16>
    %c0_16 = arith.constant 0 : index
    %c0_17 = arith.constant 0 : index
    %c0_18 = arith.constant 0 : index
    %34 = vector.load %arg5[%c0_16, %c0_17, %c0_18] : memref<2x1x96xf32, #tpu.memory_space<vmem>>, vector<1x1x96xf32>
    %35 = vector.shape_cast %34 : vector<1x1x96xf32> to vector<1x96xf32>
    %c0_19 = arith.constant 0 : index
    %c0_20 = arith.constant 0 : index
    %c0_21 = arith.constant 0 : index
    %36 = vector.load %arg6[%c0_19, %c0_20, %c0_21] : memref<2x32x32xbf16, #tpu.memory_space<vmem>>, vector<1x32x32xbf16>
    %37 = vector.shape_cast %36 : vector<1x32x32xbf16> to vector<32x32xbf16>
    %c0_22 = arith.constant 0 : index
    %c0_23 = arith.constant 0 : index
    %c0_24 = arith.constant 0 : index
    %38 = vector.load %arg7[%c0_22, %c0_23, %c0_24] : memref<2x1x32xf32, #tpu.memory_space<vmem>>, vector<1x1x32xf32>
    %39 = vector.shape_cast %38 : vector<1x1x32xf32> to vector<1x32xf32>
    %c0_25 = arith.constant 0 : index
    %c0_26 = arith.constant 0 : index
    %c0_27 = arith.constant 0 : index
    %40 = vector.load %arg8[%c0_25, %c0_26, %c0_27] : memref<2x1x32xf32, #tpu.memory_space<vmem>>, vector<1x1x32xf32>
    %41 = vector.shape_cast %40 : vector<1x1x32xf32> to vector<1x32xf32>
    %c0_28 = arith.constant 0 : index
    %c0_29 = arith.constant 0 : index
    %c0_30 = arith.constant 0 : index
    %42 = vector.load %arg9[%c0_28, %c0_29, %c0_30] : memref<2x1x32xf32, #tpu.memory_space<vmem>>, vector<1x1x32xf32>
    %43 = vector.shape_cast %42 : vector<1x1x32xf32> to vector<1x32xf32>
    %c0_31 = arith.constant 0 : index
    %c0_32 = arith.constant 0 : index
    %c0_33 = arith.constant 0 : index
    %44 = vector.load %arg10[%c0_31, %c0_32, %c0_33] : memref<2x32x64xbf16, #tpu.memory_space<vmem>>, vector<1x32x64xbf16>
    %45 = vector.shape_cast %44 : vector<1x32x64xbf16> to vector<32x64xbf16>
    %c0_34 = arith.constant 0 : index
    %c0_35 = arith.constant 0 : index
    %c0_36 = arith.constant 0 : index
    %46 = vector.load %arg11[%c0_34, %c0_35, %c0_36] : memref<2x1x64xf32, #tpu.memory_space<vmem>>, vector<1x1x64xf32>
    %47 = vector.shape_cast %46 : vector<1x1x64xf32> to vector<1x64xf32>
    %c0_37 = arith.constant 0 : index
    %c0_38 = arith.constant 0 : index
    %c0_39 = arith.constant 0 : index
    %48 = vector.load %arg12[%c0_37, %c0_38, %c0_39] : memref<2x64x32xbf16, #tpu.memory_space<vmem>>, vector<1x64x32xbf16>
    %49 = vector.shape_cast %48 : vector<1x64x32xbf16> to vector<64x32xbf16>
    %c0_40 = arith.constant 0 : index
    %c0_41 = arith.constant 0 : index
    %c0_42 = arith.constant 0 : index
    %50 = vector.load %arg13[%c0_40, %c0_41, %c0_42] : memref<2x1x32xf32, #tpu.memory_space<vmem>>, vector<1x1x32xf32>
    %51 = vector.shape_cast %50 : vector<1x1x32xf32> to vector<1x32xf32>
    %c0_43 = arith.constant 0 : index
    %c0_44 = arith.constant 0 : index
    %c0_45 = arith.constant 0 : index
    %52 = vector.load %arg14[%c0_43, %c0_44, %c0_45] : memref<2x1x32xf32, #tpu.memory_space<vmem>>, vector<1x1x32xf32>
    %53 = vector.shape_cast %52 : vector<1x1x32xf32> to vector<1x32xf32>
    %c0_46 = arith.constant 0 : index
    %c0_47 = arith.constant 0 : index
    %c0_48 = arith.constant 0 : index
    %54 = vector.load %arg15[%c0_46, %c0_47, %c0_48] : memref<2x1x32xf32, #tpu.memory_space<vmem>>, vector<1x1x32xf32>
    %55 = vector.shape_cast %54 : vector<1x1x32xf32> to vector<1x32xf32>
    %56 = arith.truncf %24 : vector<16x32xf32> to vector<16x32xbf16>
    %cst_49 = arith.constant dense<0.000000e+00> : vector<16x96xf32>
    %57 = tpu.matmul %56, %33, %cst_49 {dimension_numbers = #tpu.dot_dimension_numbers<[1], [0], [0], [1], [0, 0, 1, 1], [], []>} : vector<16x32xbf16>, vector<32x96xbf16>, vector<16x96xf32> -> vector<16x96xf32>
    %58 = vector.broadcast %35 : vector<1x96xf32> to vector<16x96xf32>
    %59 = arith.addf %57, %58 : vector<16x96xf32>
    %60 = vector.shape_cast %59 : vector<16x96xf32> to vector<2x8x96xf32>
    %61 = vector.extract_strided_slice %60 {offsets = [0, 0, 0], sizes = [2, 8, 8], strides = [1, 1, 1]} : vector<2x8x96xf32> to vector<2x8x8xf32>
    %62 = vector.extract_strided_slice %60 {offsets = [0, 0, 8], sizes = [2, 8, 8], strides = [1, 1, 1]} : vector<2x8x96xf32> to vector<2x8x8xf32>
    %63 = vector.extract_strided_slice %60 {offsets = [0, 0, 16], sizes = [2, 8, 8], strides = [1, 1, 1]} : vector<2x8x96xf32> to vector<2x8x8xf32>
    %64 = vector.extract_strided_slice %60 {offsets = [0, 0, 24], sizes = [2, 8, 8], strides = [1, 1, 1]} : vector<2x8x96xf32> to vector<2x8x8xf32>
    %65 = tpu.concatenate %61, %62, %63, %64 in 0 : vector<2x8x8xf32>, vector<2x8x8xf32>, vector<2x8x8xf32>, vector<2x8x8xf32> -> vector<8x8x8xf32>
    %66 = arith.truncf %65 : vector<8x8x8xf32> to vector<8x8x8xbf16>
    %67 = vector.extract_strided_slice %60 {offsets = [0, 0, 32], sizes = [2, 8, 8], strides = [1, 1, 1]} : vector<2x8x96xf32> to vector<2x8x8xf32>
    %68 = vector.extract_strided_slice %60 {offsets = [0, 0, 40], sizes = [2, 8, 8], strides = [1, 1, 1]} : vector<2x8x96xf32> to vector<2x8x8xf32>
    %69 = vector.extract_strided_slice %60 {offsets = [0, 0, 48], sizes = [2, 8, 8], strides = [1, 1, 1]} : vector<2x8x96xf32> to vector<2x8x8xf32>
    %70 = vector.extract_strided_slice %60 {offsets = [0, 0, 56], sizes = [2, 8, 8], strides = [1, 1, 1]} : vector<2x8x96xf32> to vector<2x8x8xf32>
    %71 = tpu.concatenate %67, %68, %69, %70 in 0 : vector<2x8x8xf32>, vector<2x8x8xf32>, vector<2x8x8xf32>, vector<2x8x8xf32> -> vector<8x8x8xf32>
    %72 = arith.truncf %71 : vector<8x8x8xf32> to vector<8x8x8xbf16>
    %73 = vector.extract_strided_slice %60 {offsets = [0, 0, 64], sizes = [2, 8, 8], strides = [1, 1, 1]} : vector<2x8x96xf32> to vector<2x8x8xf32>
    %74 = vector.extract_strided_slice %60 {offsets = [0, 0, 72], sizes = [2, 8, 8], strides = [1, 1, 1]} : vector<2x8x96xf32> to vector<2x8x8xf32>
    %75 = vector.extract_strided_slice %60 {offsets = [0, 0, 80], sizes = [2, 8, 8], strides = [1, 1, 1]} : vector<2x8x96xf32> to vector<2x8x8xf32>
    %76 = vector.extract_strided_slice %60 {offsets = [0, 0, 88], sizes = [2, 8, 8], strides = [1, 1, 1]} : vector<2x8x96xf32> to vector<2x8x8xf32>
    %77 = tpu.concatenate %73, %74, %75, %76 in 0 : vector<2x8x8xf32>, vector<2x8x8xf32>, vector<2x8x8xf32>, vector<2x8x8xf32> -> vector<8x8x8xf32>
    %78 = arith.truncf %77 : vector<8x8x8xf32> to vector<8x8x8xbf16>
    "tpu.trace_start"() <{level = 10 : i32, message = "nqd,nkd->nqk"}> : () -> ()
    %cst_50 = arith.constant dense<0.000000e+00> : vector<8x8x8xf32>
    %79 = tpu.matmul %66, %72, %cst_50 {dimension_numbers = #tpu.dot_dimension_numbers<[2], [2], [1], [1], [0, 0, 0, 1, 1, 1], [0], [0]>} : vector<8x8x8xbf16>, vector<8x8x8xbf16>, vector<8x8x8xf32> -> vector<8x8x8xf32>
    "tpu.trace_stop"() : () -> ()
    %cst_51 = arith.constant 0.353553385 : f32
    %80 = vector.broadcast %cst_51 : f32 to vector<8x8x8xf32>
    %81 = arith.mulf %79, %80 : vector<8x8x8xf32>
    %82 = vector.broadcast %31 : vector<8x1x8xf32> to vector<8x8x8xf32>
    %83 = arith.addf %81, %82 : vector<8x8x8xf32>
    %cst_52 = arith.constant dense<0xFF800000> : vector<8x8xf32>
    %84 = vector.multi_reduction <maximumf>, %83, %cst_52 [2] : vector<8x8x8xf32> to vector<8x8xf32>
    %85 = vector.shape_cast %84 : vector<8x8xf32> to vector<8x8x1xf32>
    %86 = vector.broadcast %85 : vector<8x8x1xf32> to vector<8x8x8xf32>
    %87 = arith.subf %83, %86 : vector<8x8x8xf32>
    %88 = math.exp %87 : vector<8x8x8xf32>
    %cst_53 = arith.constant dense<0.000000e+00> : vector<8x8xf32>
    %89 = vector.multi_reduction <add>, %88, %cst_53 [2] : vector<8x8x8xf32> to vector<8x8xf32>
    %90 = vector.shape_cast %89 : vector<8x8xf32> to vector<8x8x1xf32>
    %91 = tpu.reciprocal %90 {approx = true} : vector<8x8x1xf32> -> vector<8x8x1xf32>
    %92 = vector.broadcast %91 : vector<8x8x1xf32> to vector<8x8x8xf32>
    %93 = arith.mulf %88, %92 : vector<8x8x8xf32>
    %94 = arith.truncf %93 : vector<8x8x8xf32> to vector<8x8x8xbf16>
    "tpu.trace_start"() <{level = 10 : i32, message = "nqk,nkd->nqd"}> : () -> ()
    %cst_54 = arith.constant dense<0.000000e+00> : vector<8x8x8xf32>
    %95 = tpu.matmul %94, %78, %cst_54 {dimension_numbers = #tpu.dot_dimension_numbers<[2], [1], [1], [2], [0, 0, 0, 1, 1, 2], [0], [0]>} : vector<8x8x8xbf16>, vector<8x8x8xbf16>, vector<8x8x8xf32> -> vector<8x8x8xf32>
    "tpu.trace_stop"() : () -> ()
    %96 = vector.extract_strided_slice %95 {offsets = [0, 0, 0], sizes = [2, 8, 8], strides = [1, 1, 1]} : vector<8x8x8xf32> to vector<2x8x8xf32>
    %97 = vector.extract_strided_slice %95 {offsets = [2, 0, 0], sizes = [2, 8, 8], strides = [1, 1, 1]} : vector<8x8x8xf32> to vector<2x8x8xf32>
    %98 = vector.extract_strided_slice %95 {offsets = [4, 0, 0], sizes = [2, 8, 8], strides = [1, 1, 1]} : vector<8x8x8xf32> to vector<2x8x8xf32>
    %99 = vector.extract_strided_slice %95 {offsets = [6, 0, 0], sizes = [2, 8, 8], strides = [1, 1, 1]} : vector<8x8x8xf32> to vector<2x8x8xf32>
    %100 = tpu.concatenate %96, %97, %98, %99 in 2 : vector<2x8x8xf32>, vector<2x8x8xf32>, vector<2x8x8xf32>, vector<2x8x8xf32> -> vector<2x8x32xf32>
    %101 = vector.shape_cast %100 : vector<2x8x32xf32> to vector<16x32xf32>
    %102 = arith.truncf %101 : vector<16x32xf32> to vector<16x32xbf16>
    %cst_55 = arith.constant dense<0.000000e+00> : vector<16x32xf32>
    %103 = tpu.matmul %102, %37, %cst_55 {dimension_numbers = #tpu.dot_dimension_numbers<[1], [0], [0], [1], [0, 0, 1, 1], [], []>} : vector<16x32xbf16>, vector<32x32xbf16>, vector<16x32xf32> -> vector<16x32xf32>
    %104 = vector.broadcast %39 : vector<1x32xf32> to vector<16x32xf32>
    %105 = arith.addf %103, %104 : vector<16x32xf32>
    %106 = arith.addf %24, %105 : vector<16x32xf32>
    %cst_56 = arith.constant dense<0.000000e+00> : vector<16xf32>
    %107 = vector.multi_reduction <add>, %106, %cst_56 [1] : vector<16x32xf32> to vector<16xf32>
    %108 = vector.shape_cast %107 : vector<16xf32> to vector<16x1xf32>
    %cst_57 = arith.constant 3.200000e+01 : f32
    %109 = vector.broadcast %cst_57 : f32 to vector<16x1xf32>
    %110 = arith.divf %108, %109 : vector<16x1xf32>
    %111 = vector.broadcast %110 : vector<16x1xf32> to vector<16x32xf32>
    %112 = arith.subf %106, %111 : vector<16x32xf32>
    %113 = arith.mulf %112, %112 : vector<16x32xf32>
    %cst_58 = arith.constant dense<0.000000e+00> : vector<16xf32>
    %114 = vector.multi_reduction <add>, %113, %cst_58 [1] : vector<16x32xf32> to vector<16xf32>
    %115 = vector.shape_cast %114 : vector<16xf32> to vector<16x1xf32>
    %cst_59 = arith.constant 3.200000e+01 : f32
    %116 = vector.broadcast %cst_59 : f32 to vector<16x1xf32>
    %117 = arith.divf %115, %116 : vector<16x1xf32>
    %118 = vector.broadcast %110 : vector<16x1xf32> to vector<16x32xf32>
    %119 = arith.subf %106, %118 : vector<16x32xf32>
    %cst_60 = arith.constant 9.99999996E-13 : f32
    %120 = vector.broadcast %cst_60 : f32 to vector<16x1xf32>
    %121 = arith.addf %117, %120 : vector<16x1xf32>
    %122 = math.rsqrt %121 : vector<16x1xf32>
    %123 = vector.broadcast %122 : vector<16x1xf32> to vector<16x32xf32>
    %124 = arith.mulf %119, %123 : vector<16x32xf32>
    %125 = vector.broadcast %41 : vector<1x32xf32> to vector<16x32xf32>
    %126 = arith.mulf %124, %125 : vector<16x32xf32>
    %127 = vector.broadcast %43 : vector<1x32xf32> to vector<16x32xf32>
    %128 = arith.addf %126, %127 : vector<16x32xf32>
    %129 = arith.truncf %128 : vector<16x32xf32> to vector<16x32xbf16>
    %cst_61 = arith.constant dense<0.000000e+00> : vector<16x64xf32>
    %130 = tpu.matmul %129, %45, %cst_61 {dimension_numbers = #tpu.dot_dimension_numbers<[1], [0], [0], [1], [0, 0, 1, 1], [], []>} : vector<16x32xbf16>, vector<32x64xbf16>, vector<16x64xf32> -> vector<16x64xf32>
    %131 = vector.broadcast %47 : vector<1x64xf32> to vector<16x64xf32>
    %132 = arith.addf %130, %131 : vector<16x64xf32>
    %cst_62 = arith.constant 5.000000e-01 : f32
    %133 = vector.broadcast %cst_62 : f32 to vector<16x64xf32>
    %134 = arith.mulf %133, %132 : vector<16x64xf32>
    %cst_63 = arith.constant 4.471500e-02 : f32
    %135 = vector.broadcast %cst_63 : f32 to vector<16x64xf32>
    %136 = arith.mulf %135, %132 : vector<16x64xf32>
    %137 = arith.mulf %136, %132 : vector<16x64xf32>
    %138 = arith.mulf %137, %132 : vector<16x64xf32>
    %139 = arith.addf %132, %138 : vector<16x64xf32>
    %cst_64 = arith.constant 0.797884583 : f32
    %140 = vector.broadcast %cst_64 : f32 to vector<16x64xf32>
    %141 = arith.mulf %140, %139 : vector<16x64xf32>
    %142 = math.tanh %141 : vector<16x64xf32>
    %cst_65 = arith.constant 1.000000e+00 : f32
    %143 = vector.broadcast %cst_65 : f32 to vector<16x64xf32>
    %144 = arith.addf %143, %142 : vector<16x64xf32>
    %145 = arith.mulf %134, %144 : vector<16x64xf32>
    %146 = arith.truncf %145 : vector<16x64xf32> to vector<16x64xbf16>
    %cst_66 = arith.constant dense<0.000000e+00> : vector<16x32xf32>
    %147 = tpu.matmul %146, %49, %cst_66 {dimension_numbers = #tpu.dot_dimension_numbers<[1], [0], [0], [1], [0, 0, 1, 1], [], []>} : vector<16x64xbf16>, vector<64x32xbf16>, vector<16x32xf32> -> vector<16x32xf32>
    %148 = vector.broadcast %51 : vector<1x32xf32> to vector<16x32xf32>
    %149 = arith.addf %147, %148 : vector<16x32xf32>
    %150 = arith.addf %128, %149 : vector<16x32xf32>
    %cst_67 = arith.constant dense<0.000000e+00> : vector<16xf32>
    %151 = vector.multi_reduction <add>, %150, %cst_67 [1] : vector<16x32xf32> to vector<16xf32>
    %152 = vector.shape_cast %151 : vector<16xf32> to vector<16x1xf32>
    %cst_68 = arith.constant 3.200000e+01 : f32
    %153 = vector.broadcast %cst_68 : f32 to vector<16x1xf32>
    %154 = arith.divf %152, %153 : vector<16x1xf32>
    %155 = vector.broadcast %154 : vector<16x1xf32> to vector<16x32xf32>
    %156 = arith.subf %150, %155 : vector<16x32xf32>
    %157 = arith.mulf %156, %156 : vector<16x32xf32>
    %cst_69 = arith.constant dense<0.000000e+00> : vector<16xf32>
    %158 = vector.multi_reduction <add>, %157, %cst_69 [1] : vector<16x32xf32> to vector<16xf32>
    %159 = vector.shape_cast %158 : vector<16xf32> to vector<16x1xf32>
    %cst_70 = arith.constant 3.200000e+01 : f32
    %160 = vector.broadcast %cst_70 : f32 to vector<16x1xf32>
    %161 = arith.divf %159, %160 : vector<16x1xf32>
    %162 = vector.broadcast %154 : vector<16x1xf32> to vector<16x32xf32>
    %163 = arith.subf %150, %162 : vector<16x32xf32>
    %cst_71 = arith.constant 9.99999996E-13 : f32
    %164 = vector.broadcast %cst_71 : f32 to vector<16x1xf32>
    %165 = arith.addf %161, %164 : vector<16x1xf32>
    %166 = math.rsqrt %165 : vector<16x1xf32>
    %167 = vector.broadcast %166 : vector<16x1xf32> to vector<16x32xf32>
    %168 = arith.mulf %163, %167 : vector<16x32xf32>
    %169 = vector.broadcast %53 : vector<1x32xf32> to vector<16x32xf32>
    %170 = arith.mulf %168, %169 : vector<16x32xf32>
    %171 = vector.broadcast %55 : vector<1x32xf32> to vector<16x32xf32>
    %172 = arith.addf %170, %171 : vector<16x32xf32>
    %c1 = arith.constant 1 : index
    %c0_72 = arith.constant 0 : index
    %c0_73 = arith.constant 0 : index
    %173 = vector.load %arg4[%c1, %c0_72, %c0_73] : memref<2x32x96xbf16, #tpu.memory_space<vmem>>, vector<1x32x96xbf16>
    %174 = vector.shape_cast %173 : vector<1x32x96xbf16> to vector<32x96xbf16>
    %c1_74 = arith.constant 1 : index
    %c0_75 = arith.constant 0 : index
    %c0_76 = arith.constant 0 : index
    %175 = vector.load %arg5[%c1_74, %c0_75, %c0_76] : memref<2x1x96xf32, #tpu.memory_space<vmem>>, vector<1x1x96xf32>
    %176 = vector.shape_cast %175 : vector<1x1x96xf32> to vector<1x96xf32>
    %c1_77 = arith.constant 1 : index
    %c0_78 = arith.constant 0 : index
    %c0_79 = arith.constant 0 : index
    %177 = vector.load %arg6[%c1_77, %c0_78, %c0_79] : memref<2x32x32xbf16, #tpu.memory_space<vmem>>, vector<1x32x32xbf16>
    %178 = vector.shape_cast %177 : vector<1x32x32xbf16> to vector<32x32xbf16>
    %c1_80 = arith.constant 1 : index
    %c0_81 = arith.constant 0 : index
    %c0_82 = arith.constant 0 : index
    %179 = vector.load %arg7[%c1_80, %c0_81, %c0_82] : memref<2x1x32xf32, #tpu.memory_space<vmem>>, vector<1x1x32xf32>
    %180 = vector.shape_cast %179 : vector<1x1x32xf32> to vector<1x32xf32>
    %c1_83 = arith.constant 1 : index
    %c0_84 = arith.constant 0 : index
    %c0_85 = arith.constant 0 : index
    %181 = vector.load %arg8[%c1_83, %c0_84, %c0_85] : memref<2x1x32xf32, #tpu.memory_space<vmem>>, vector<1x1x32xf32>
    %182 = vector.shape_cast %181 : vector<1x1x32xf32> to vector<1x32xf32>
    %c1_86 = arith.constant 1 : index
    %c0_87 = arith.constant 0 : index
    %c0_88 = arith.constant 0 : index
    %183 = vector.load %arg9[%c1_86, %c0_87, %c0_88] : memref<2x1x32xf32, #tpu.memory_space<vmem>>, vector<1x1x32xf32>
    %184 = vector.shape_cast %183 : vector<1x1x32xf32> to vector<1x32xf32>
    %c1_89 = arith.constant 1 : index
    %c0_90 = arith.constant 0 : index
    %c0_91 = arith.constant 0 : index
    %185 = vector.load %arg10[%c1_89, %c0_90, %c0_91] : memref<2x32x64xbf16, #tpu.memory_space<vmem>>, vector<1x32x64xbf16>
    %186 = vector.shape_cast %185 : vector<1x32x64xbf16> to vector<32x64xbf16>
    %c1_92 = arith.constant 1 : index
    %c0_93 = arith.constant 0 : index
    %c0_94 = arith.constant 0 : index
    %187 = vector.load %arg11[%c1_92, %c0_93, %c0_94] : memref<2x1x64xf32, #tpu.memory_space<vmem>>, vector<1x1x64xf32>
    %188 = vector.shape_cast %187 : vector<1x1x64xf32> to vector<1x64xf32>
    %c1_95 = arith.constant 1 : index
    %c0_96 = arith.constant 0 : index
    %c0_97 = arith.constant 0 : index
    %189 = vector.load %arg12[%c1_95, %c0_96, %c0_97] : memref<2x64x32xbf16, #tpu.memory_space<vmem>>, vector<1x64x32xbf16>
    %190 = vector.shape_cast %189 : vector<1x64x32xbf16> to vector<64x32xbf16>
    %c1_98 = arith.constant 1 : index
    %c0_99 = arith.constant 0 : index
    %c0_100 = arith.constant 0 : index
    %191 = vector.load %arg13[%c1_98, %c0_99, %c0_100] : memref<2x1x32xf32, #tpu.memory_space<vmem>>, vector<1x1x32xf32>
    %192 = vector.shape_cast %191 : vector<1x1x32xf32> to vector<1x32xf32>
    %c1_101 = arith.constant 1 : index
    %c0_102 = arith.constant 0 : index
    %c0_103 = arith.constant 0 : index
    %193 = vector.load %arg14[%c1_101, %c0_102, %c0_103] : memref<2x1x32xf32, #tpu.memory_space<vmem>>, vector<1x1x32xf32>
    %194 = vector.shape_cast %193 : vector<1x1x32xf32> to vector<1x32xf32>
    %c1_104 = arith.constant 1 : index
    %c0_105 = arith.constant 0 : index
    %c0_106 = arith.constant 0 : index
    %195 = vector.load %arg15[%c1_104, %c0_105, %c0_106] : memref<2x1x32xf32, #tpu.memory_space<vmem>>, vector<1x1x32xf32>
    %196 = vector.shape_cast %195 : vector<1x1x32xf32> to vector<1x32xf32>
    %197 = arith.truncf %172 : vector<16x32xf32> to vector<16x32xbf16>
    %cst_107 = arith.constant dense<0.000000e+00> : vector<16x96xf32>
    %198 = tpu.matmul %197, %174, %cst_107 {dimension_numbers = #tpu.dot_dimension_numbers<[1], [0], [0], [1], [0, 0, 1, 1], [], []>} : vector<16x32xbf16>, vector<32x96xbf16>, vector<16x96xf32> -> vector<16x96xf32>
    %199 = vector.broadcast %176 : vector<1x96xf32> to vector<16x96xf32>
    %200 = arith.addf %198, %199 : vector<16x96xf32>
    %201 = vector.shape_cast %200 : vector<16x96xf32> to vector<2x8x96xf32>
    %202 = vector.extract_strided_slice %201 {offsets = [0, 0, 0], sizes = [2, 8, 8], strides = [1, 1, 1]} : vector<2x8x96xf32> to vector<2x8x8xf32>
    %203 = vector.extract_strided_slice %201 {offsets = [0, 0, 8], sizes = [2, 8, 8], strides = [1, 1, 1]} : vector<2x8x96xf32> to vector<2x8x8xf32>
    %204 = vector.extract_strided_slice %201 {offsets = [0, 0, 16], sizes = [2, 8, 8], strides = [1, 1, 1]} : vector<2x8x96xf32> to vector<2x8x8xf32>
    %205 = vector.extract_strided_slice %201 {offsets = [0, 0, 24], sizes = [2, 8, 8], strides = [1, 1, 1]} : vector<2x8x96xf32> to vector<2x8x8xf32>
    %206 = tpu.concatenate %202, %203, %204, %205 in 0 : vector<2x8x8xf32>, vector<2x8x8xf32>, vector<2x8x8xf32>, vector<2x8x8xf32> -> vector<8x8x8xf32>
    %207 = arith.truncf %206 : vector<8x8x8xf32> to vector<8x8x8xbf16>
    %208 = vector.extract_strided_slice %201 {offsets = [0, 0, 32], sizes = [2, 8, 8], strides = [1, 1, 1]} : vector<2x8x96xf32> to vector<2x8x8xf32>
    %209 = vector.extract_strided_slice %201 {offsets = [0, 0, 40], sizes = [2, 8, 8], strides = [1, 1, 1]} : vector<2x8x96xf32> to vector<2x8x8xf32>
    %210 = vector.extract_strided_slice %201 {offsets = [0, 0, 48], sizes = [2, 8, 8], strides = [1, 1, 1]} : vector<2x8x96xf32> to vector<2x8x8xf32>
    %211 = vector.extract_strided_slice %201 {offsets = [0, 0, 56], sizes = [2, 8, 8], strides = [1, 1, 1]} : vector<2x8x96xf32> to vector<2x8x8xf32>
    %212 = tpu.concatenate %208, %209, %210, %211 in 0 : vector<2x8x8xf32>, vector<2x8x8xf32>, vector<2x8x8xf32>, vector<2x8x8xf32> -> vector<8x8x8xf32>
    %213 = arith.truncf %212 : vector<8x8x8xf32> to vector<8x8x8xbf16>
    %214 = vector.extract_strided_slice %201 {offsets = [0, 0, 64], sizes = [2, 8, 8], strides = [1, 1, 1]} : vector<2x8x96xf32> to vector<2x8x8xf32>
    %215 = vector.extract_strided_slice %201 {offsets = [0, 0, 72], sizes = [2, 8, 8], strides = [1, 1, 1]} : vector<2x8x96xf32> to vector<2x8x8xf32>
    %216 = vector.extract_strided_slice %201 {offsets = [0, 0, 80], sizes = [2, 8, 8], strides = [1, 1, 1]} : vector<2x8x96xf32> to vector<2x8x8xf32>
    %217 = vector.extract_strided_slice %201 {offsets = [0, 0, 88], sizes = [2, 8, 8], strides = [1, 1, 1]} : vector<2x8x96xf32> to vector<2x8x8xf32>
    %218 = tpu.concatenate %214, %215, %216, %217 in 0 : vector<2x8x8xf32>, vector<2x8x8xf32>, vector<2x8x8xf32>, vector<2x8x8xf32> -> vector<8x8x8xf32>
    %219 = arith.truncf %218 : vector<8x8x8xf32> to vector<8x8x8xbf16>
    "tpu.trace_start"() <{level = 10 : i32, message = "nqd,nkd->nqk"}> : () -> ()
    %cst_108 = arith.constant dense<0.000000e+00> : vector<8x8x8xf32>
    %220 = tpu.matmul %207, %213, %cst_108 {dimension_numbers = #tpu.dot_dimension_numbers<[2], [2], [1], [1], [0, 0, 0, 1, 1, 1], [0], [0]>} : vector<8x8x8xbf16>, vector<8x8x8xbf16>, vector<8x8x8xf32> -> vector<8x8x8xf32>
    "tpu.trace_stop"() : () -> ()
    %cst_109 = arith.constant 0.353553385 : f32
    %221 = vector.broadcast %cst_109 : f32 to vector<8x8x8xf32>
    %222 = arith.mulf %220, %221 : vector<8x8x8xf32>
    %223 = vector.broadcast %31 : vector<8x1x8xf32> to vector<8x8x8xf32>
    %224 = arith.addf %222, %223 : vector<8x8x8xf32>
    %cst_110 = arith.constant dense<0xFF800000> : vector<8x8xf32>
    %225 = vector.multi_reduction <maximumf>, %224, %cst_110 [2] : vector<8x8x8xf32> to vector<8x8xf32>
    %226 = vector.shape_cast %225 : vector<8x8xf32> to vector<8x8x1xf32>
    %227 = vector.broadcast %226 : vector<8x8x1xf32> to vector<8x8x8xf32>
    %228 = arith.subf %224, %227 : vector<8x8x8xf32>
    %229 = math.exp %228 : vector<8x8x8xf32>
    %cst_111 = arith.constant dense<0.000000e+00> : vector<8x8xf32>
    %230 = vector.multi_reduction <add>, %229, %cst_111 [2] : vector<8x8x8xf32> to vector<8x8xf32>
    %231 = vector.shape_cast %230 : vector<8x8xf32> to vector<8x8x1xf32>
    %232 = tpu.reciprocal %231 {approx = true} : vector<8x8x1xf32> -> vector<8x8x1xf32>
    %233 = vector.broadcast %232 : vector<8x8x1xf32> to vector<8x8x8xf32>
    %234 = arith.mulf %229, %233 : vector<8x8x8xf32>
    %235 = arith.truncf %234 : vector<8x8x8xf32> to vector<8x8x8xbf16>
    "tpu.trace_start"() <{level = 10 : i32, message = "nqk,nkd->nqd"}> : () -> ()
    %cst_112 = arith.constant dense<0.000000e+00> : vector<8x8x8xf32>
    %236 = tpu.matmul %235, %219, %cst_112 {dimension_numbers = #tpu.dot_dimension_numbers<[2], [1], [1], [2], [0, 0, 0, 1, 1, 2], [0], [0]>} : vector<8x8x8xbf16>, vector<8x8x8xbf16>, vector<8x8x8xf32> -> vector<8x8x8xf32>
    "tpu.trace_stop"() : () -> ()
    %237 = vector.extract_strided_slice %236 {offsets = [0, 0, 0], sizes = [2, 8, 8], strides = [1, 1, 1]} : vector<8x8x8xf32> to vector<2x8x8xf32>
    %238 = vector.extract_strided_slice %236 {offsets = [2, 0, 0], sizes = [2, 8, 8], strides = [1, 1, 1]} : vector<8x8x8xf32> to vector<2x8x8xf32>
    %239 = vector.extract_strided_slice %236 {offsets = [4, 0, 0], sizes = [2, 8, 8], strides = [1, 1, 1]} : vector<8x8x8xf32> to vector<2x8x8xf32>
    %240 = vector.extract_strided_slice %236 {offsets = [6, 0, 0], sizes = [2, 8, 8], strides = [1, 1, 1]} : vector<8x8x8xf32> to vector<2x8x8xf32>
    %241 = tpu.concatenate %237, %238, %239, %240 in 2 : vector<2x8x8xf32>, vector<2x8x8xf32>, vector<2x8x8xf32>, vector<2x8x8xf32> -> vector<2x8x32xf32>
    %242 = vector.shape_cast %241 : vector<2x8x32xf32> to vector<16x32xf32>
    %243 = arith.truncf %242 : vector<16x32xf32> to vector<16x32xbf16>
    %cst_113 = arith.constant dense<0.000000e+00> : vector<16x32xf32>
    %244 = tpu.matmul %243, %178, %cst_113 {dimension_numbers = #tpu.dot_dimension_numbers<[1], [0], [0], [1], [0, 0, 1, 1], [], []>} : vector<16x32xbf16>, vector<32x32xbf16>, vector<16x32xf32> -> vector<16x32xf32>
    %245 = vector.broadcast %180 : vector<1x32xf32> to vector<16x32xf32>
    %246 = arith.addf %244, %245 : vector<16x32xf32>
    %247 = arith.addf %172, %246 : vector<16x32xf32>
    %cst_114 = arith.constant dense<0.000000e+00> : vector<16xf32>
    %248 = vector.multi_reduction <add>, %247, %cst_114 [1] : vector<16x32xf32> to vector<16xf32>
    %249 = vector.shape_cast %248 : vector<16xf32> to vector<16x1xf32>
    %cst_115 = arith.constant 3.200000e+01 : f32
    %250 = vector.broadcast %cst_115 : f32 to vector<16x1xf32>
    %251 = arith.divf %249, %250 : vector<16x1xf32>
    %252 = vector.broadcast %251 : vector<16x1xf32> to vector<16x32xf32>
    %253 = arith.subf %247, %252 : vector<16x32xf32>
    %254 = arith.mulf %253, %253 : vector<16x32xf32>
    %cst_116 = arith.constant dense<0.000000e+00> : vector<16xf32>
    %255 = vector.multi_reduction <add>, %254, %cst_116 [1] : vector<16x32xf32> to vector<16xf32>
    %256 = vector.shape_cast %255 : vector<16xf32> to vector<16x1xf32>
    %cst_117 = arith.constant 3.200000e+01 : f32
    %257 = vector.broadcast %cst_117 : f32 to vector<16x1xf32>
    %258 = arith.divf %256, %257 : vector<16x1xf32>
    %259 = vector.broadcast %251 : vector<16x1xf32> to vector<16x32xf32>
    %260 = arith.subf %247, %259 : vector<16x32xf32>
    %cst_118 = arith.constant 9.99999996E-13 : f32
    %261 = vector.broadcast %cst_118 : f32 to vector<16x1xf32>
    %262 = arith.addf %258, %261 : vector<16x1xf32>
    %263 = math.rsqrt %262 : vector<16x1xf32>
    %264 = vector.broadcast %263 : vector<16x1xf32> to vector<16x32xf32>
    %265 = arith.mulf %260, %264 : vector<16x32xf32>
    %266 = vector.broadcast %182 : vector<1x32xf32> to vector<16x32xf32>
    %267 = arith.mulf %265, %266 : vector<16x32xf32>
    %268 = vector.broadcast %184 : vector<1x32xf32> to vector<16x32xf32>
    %269 = arith.addf %267, %268 : vector<16x32xf32>
    %270 = arith.truncf %269 : vector<16x32xf32> to vector<16x32xbf16>
    %cst_119 = arith.constant dense<0.000000e+00> : vector<16x64xf32>
    %271 = tpu.matmul %270, %186, %cst_119 {dimension_numbers = #tpu.dot_dimension_numbers<[1], [0], [0], [1], [0, 0, 1, 1], [], []>} : vector<16x32xbf16>, vector<32x64xbf16>, vector<16x64xf32> -> vector<16x64xf32>
    %272 = vector.broadcast %188 : vector<1x64xf32> to vector<16x64xf32>
    %273 = arith.addf %271, %272 : vector<16x64xf32>
    %cst_120 = arith.constant 5.000000e-01 : f32
    %274 = vector.broadcast %cst_120 : f32 to vector<16x64xf32>
    %275 = arith.mulf %274, %273 : vector<16x64xf32>
    %cst_121 = arith.constant 4.471500e-02 : f32
    %276 = vector.broadcast %cst_121 : f32 to vector<16x64xf32>
    %277 = arith.mulf %276, %273 : vector<16x64xf32>
    %278 = arith.mulf %277, %273 : vector<16x64xf32>
    %279 = arith.mulf %278, %273 : vector<16x64xf32>
    %280 = arith.addf %273, %279 : vector<16x64xf32>
    %cst_122 = arith.constant 0.797884583 : f32
    %281 = vector.broadcast %cst_122 : f32 to vector<16x64xf32>
    %282 = arith.mulf %281, %280 : vector<16x64xf32>
    %283 = math.tanh %282 : vector<16x64xf32>
    %cst_123 = arith.constant 1.000000e+00 : f32
    %284 = vector.broadcast %cst_123 : f32 to vector<16x64xf32>
    %285 = arith.addf %284, %283 : vector<16x64xf32>
    %286 = arith.mulf %275, %285 : vector<16x64xf32>
    %287 = arith.truncf %286 : vector<16x64xf32> to vector<16x64xbf16>
    %cst_124 = arith.constant dense<0.000000e+00> : vector<16x32xf32>
    %288 = tpu.matmul %287, %190, %cst_124 {dimension_numbers = #tpu.dot_dimension_numbers<[1], [0], [0], [1], [0, 0, 1, 1], [], []>} : vector<16x64xbf16>, vector<64x32xbf16>, vector<16x32xf32> -> vector<16x32xf32>
    %289 = vector.broadcast %192 : vector<1x32xf32> to vector<16x32xf32>
    %290 = arith.addf %288, %289 : vector<16x32xf32>
    %291 = arith.addf %269, %290 : vector<16x32xf32>
    %cst_125 = arith.constant dense<0.000000e+00> : vector<16xf32>
    %292 = vector.multi_reduction <add>, %291, %cst_125 [1] : vector<16x32xf32> to vector<16xf32>
    %293 = vector.shape_cast %292 : vector<16xf32> to vector<16x1xf32>
    %cst_126 = arith.constant 3.200000e+01 : f32
    %294 = vector.broadcast %cst_126 : f32 to vector<16x1xf32>
    %295 = arith.divf %293, %294 : vector<16x1xf32>
    %296 = vector.broadcast %295 : vector<16x1xf32> to vector<16x32xf32>
    %297 = arith.subf %291, %296 : vector<16x32xf32>
    %298 = arith.mulf %297, %297 : vector<16x32xf32>
    %cst_127 = arith.constant dense<0.000000e+00> : vector<16xf32>
    %299 = vector.multi_reduction <add>, %298, %cst_127 [1] : vector<16x32xf32> to vector<16xf32>
    %300 = vector.shape_cast %299 : vector<16xf32> to vector<16x1xf32>
    %cst_128 = arith.constant 3.200000e+01 : f32
    %301 = vector.broadcast %cst_128 : f32 to vector<16x1xf32>
    %302 = arith.divf %300, %301 : vector<16x1xf32>
    %303 = vector.broadcast %295 : vector<16x1xf32> to vector<16x32xf32>
    %304 = arith.subf %291, %303 : vector<16x32xf32>
    %cst_129 = arith.constant 9.99999996E-13 : f32
    %305 = vector.broadcast %cst_129 : f32 to vector<16x1xf32>
    %306 = arith.addf %302, %305 : vector<16x1xf32>
    %307 = math.rsqrt %306 : vector<16x1xf32>
    %308 = vector.broadcast %307 : vector<16x1xf32> to vector<16x32xf32>
    %309 = arith.mulf %304, %308 : vector<16x32xf32>
    %310 = vector.broadcast %194 : vector<1x32xf32> to vector<16x32xf32>
    %311 = arith.mulf %309, %310 : vector<16x32xf32>
    %312 = vector.broadcast %196 : vector<1x32xf32> to vector<16x32xf32>
    %313 = arith.addf %311, %312 : vector<16x32xf32>
    %314 = vector.extract_strided_slice %313 {offsets = [0, 0], sizes = [1, 32], strides = [1, 1]} : vector<16x32xf32> to vector<1x32xf32>
    %315 = vector.extract_strided_slice %313 {offsets = [8, 0], sizes = [1, 32], strides = [1, 1]} : vector<16x32xf32> to vector<1x32xf32>
    %316 = tpu.concatenate %314, %315 in 0 : vector<1x32xf32>, vector<1x32xf32> -> vector<2x32xf32>
    %317 = arith.truncf %316 : vector<2x32xf32> to vector<2x32xbf16>
    %c0_130 = arith.constant 0 : index
    %c0_131 = arith.constant 0 : index
    %318 = vector.load %arg16[%c0_130, %c0_131] : memref<32x2xbf16, #tpu.memory_space<vmem>>, vector<32x2xbf16>
    %cst_132 = arith.constant dense<0.000000e+00> : vector<2x2xf32>
    %319 = tpu.matmul %317, %318, %cst_132 {dimension_numbers = #tpu.dot_dimension_numbers<[1], [0], [0], [1], [0, 0, 1, 1], [], []>} : vector<2x32xbf16>, vector<32x2xbf16>, vector<2x2xf32> -> vector<2x2xf32>
    %c0_133 = arith.constant 0 : index
    %c0_134 = arith.constant 0 : index
    %320 = vector.load %arg17[%c0_133, %c0_134] : memref<1x2xf32, #tpu.memory_space<vmem>>, vector<1x2xf32>
    %321 = vector.broadcast %320 : vector<1x2xf32> to vector<2x2xf32>
    %322 = arith.addf %319, %321 : vector<2x2xf32>
    %c0_135 = arith.constant 0 : index
    %c0_136 = arith.constant 0 : index
    %323 = vector.load %arg18[%c0_135, %c0_136] : memref<2x2xf32, #tpu.memory_space<vmem>>, vector<2x2xf32>
    tpu.vector_store %arg18[%c0_135, %c0_136], %322 {strides = array<i32>} : memref<2x2xf32, #tpu.memory_space<vmem>>, vector<2x2xf32>,
    return
  }
}

</mosaic_0001>

<bundles_post_ra>
// kernel: bert_forward.1
= control target key start
LH: loop header
LB: loop body
LE: loop exit
PB: predicated region body
PF: predicated region fallthrough
CT: control target
= control target key end

     0   :  { %s4368_s0 = inlined_call_operand.vmem [shape: f32[16,32], index: 0, kind: input, shape index: {}]   ;;  %s4369_s1 = inlined_call_operand.vmem [shape: f32[2,8], index: 1, kind: input, shape index: {}]   ;;  %s4370_s2 = inlined_call_operand.vmem [shape: f32[1,32], index: 2, kind: input, shape index: {}]   ;;  %s4371_s3 = inlined_call_operand.vmem [shape: f32[1,32], index: 3, kind: input, shape index: {}]   ;;  %s4372_s4 = inlined_call_operand.vmem [shape: bf16[2,32,96], index: 4, kind: input, shape index: {}]   ;;  %s4373_s5 = inlined_call_operand.vmem [shape: f32[2,1,96], index: 5, kind: input, shape index: {}]   ;;  %s4374_s6 = inlined_call_operand.vmem [shape: bf16[2,32,32], index: 6, kind: input, shape index: {}]   ;;  %s4375_s7 = inlined_call_operand.vmem [shape: f32[2,1,32], index: 7, kind: input, shape index: {}]   ;;  %s4376_s8 = inlined_call_operand.vmem [shape: f32[2,1,32], index: 8, kind: input, shape index: {}]   ;;  %s4377_s9 = inlined_call_operand.vmem [shape: f32[2,1,32], index: 9, kind: input, shape index: {}]   ;;  %s4378_s10 = inlined_call_operand.vmem [shape: bf16[2,32,64], index: 10, kind: input, shape index: {}]   ;;  %s4379_s11 = inlined_call_operand.vmem [shape: f32[2,1,64], index: 11, kind: input, shape index: {}]   ;;  %s4380_s12 = inlined_call_operand.vmem [shape: bf16[2,64,32], index: 12, kind: input, shape index: {}]   ;;  %s4381_s13 = inlined_call_operand.vmem [shape: f32[2,1,32], index: 13, kind: input, shape index: {}]   ;;  %s4382_s14 = inlined_call_operand.vmem [shape: f32[2,1,32], index: 14, kind: input, shape index: {}]   ;;  %s4383_s15 = inlined_call_operand.vmem [shape: f32[2,1,32], index: 15, kind: input, shape index: {}]   ;;  %s4384_s16 = inlined_call_operand.vmem [shape: bf16[32,2], index: 16, kind: input, shape index: {}]   ;;  %s4385_s17 = inlined_call_operand.vmem [shape: f32[1,2], index: 17, kind: input, shape index: {}]   ;;  %s4386_s18 = inlined_call_operand.hbm [shape: f32[2,2], index: 18, kind: output, shape index: {}]  }
   0x1   :  { %4388 = sst [smem:[#allocation5_spill]] %s4368_s0 }
   0x2   :  { %4389 = sst [smem:[#allocation6_spill]] %s4369_s1 }
   0x3   :  { %4390 = sst [smem:[#allocation7_spill]] %s4370_s2 }
   0x4   :  { %s4391_s29 = sld [smem:[#allocation5_spill]]  ;;  %vm65_vm0 = vcmask 261120  }
   0xa   :  { %v61_v0 = vld [vmem:[%s4391_s29] sm:$0xff]  ;;  %v62_v1 = vld [vmem:[%s4391_s29 + $0x8] sm:$0xff] }
   0xb   :  { %v66_v2 = vsel %vm65_vm0, %v61_v0, 0.0  ;;  %v69_v3 = vsel %vm65_vm0, %v62_v1, 0.0 }
   0xc   :  { %67 = vadd.xlane.f32.xlu0 %v66_v2 }
  0x10   :  { %70 = vadd.xlane.f32.xlu0 %v69_v3 }
  0x11   :  { %23 = vsyncpa [#allocation3], 0  ;;  %v3487_v14 = vld [vmem:[%s4372_s4 + $0x8] sm:$0xff]   ;;  %v3623_v15 = vmov 0.0   ;;  %vm3624_vm1 = vmmov 0   ;;  %v3488_v16 = vld [vmem:[%s4372_s4] sm:$0xff]  }
  0x12   :  { %3143 = vmatprep.subr.bf16.mxu0 %v3623_v15  ;;  %3147 = vmatprep.mubr.msk.bf16.mxu0 %vm3624_vm1, %v3623_v15  ;;  %s4392_s23 = sld [smem:[#allocation7_spill]]  ;;  %v2939_v29 = vld [vmem:[%s4371_s3] ss:$0 sm:$0xff]  ;;  %s3625_s3 = smov 112   ;;  %vm257_vm2 = vcmask 64512   ;;  %vm774_vm3 = vcmask 1043456  }
  0x13   :  { %3144 = vmatpush3.bf16.msra.mxu0 %v3487_v14  ;;  %3151 = vmatprep.subr.bf16.mxu1 %v3623_v15  ;;  %v2940_v35 = vld [vmem:[%s4373_s5] ss:$0 sm:$0xff]  ;;  %s3626_s28 = smov 120   ;;  %s3627_s29 = smov 104   ;;  %vm1180_vm4 = vcmask 130048   ;;  %vm1183_vm5 = vcmask 195584  }
  0x14   :  { %3145 = vmatprep.subr.bf16.mxu0 %v3623_v15  ;;  %3153 = vmatprep.mubr.msk.bf16.mxu1 %vm3624_vm1, %v3623_v15  ;;  %s3628_s30 = smov 96   ;;  %s3629_s0 = smov 64   ;;  %vm1405_vm6 = vcmask 523264   ;;  %vm2853_vm7 = vcmask 1040384   ;;  %vm2922_vm8 = vcmask 9216  }
  0x15   :  { %s4393_s20 = sld [smem:[#allocation6_spill]]  ;;  %s3631_s21 = smov 8  }
  0x16   :  { %s3632_s25 = smov 16   ;;  %s3633_s26 = smov 24  }
  0x17   :  { %3146 = vmatpush3.bf16.msra.mxu0 %v3488_v16  ;;  %v116_v16 = vlaneseq }
  0x18   :  { %3157 = vmatprep.subr.bf16.mxu0 %v3623_v15  ;;  %v2938_v25 = vld [vmem:[%s4392_s23] ss:$0 sm:$0xff] }
  0x95   :  { %v68_v4 = vpop.xlane.xlu0 %67 }
  0x96   :  { %v73_v5 = vmul.f32 0.03125, %v68_v4 }
  0x98   :  { %v75_v6 = vsub.f32 %v61_v0, %v73_v5 }
  0x99   :  { %v71_v7 = vpop.xlane.xlu0 %70 }
  0x9a   :  { %v74_v8 = vmul.f32 0.03125, %v71_v7  ;;  %v77_v9 = vmul.f32 %v75_v6, %v75_v6 }
  0x9c   :  { %v76_v10 = vsub.f32 %v62_v1, %v74_v8  ;;  %v79_v11 = vsel %vm65_vm0, %v77_v9, 0.0 }
  0x9d   :  { %80 = vadd.xlane.f32.xlu1 %v79_v11 }
  0x9e   :  { %v78_v12 = vmul.f32 %v76_v10, %v76_v10 }
  0xa0   :  { %v82_v13 = vsel %vm65_vm0, %v78_v12, 0.0 }
  0xa1   :  { %83 = vadd.xlane.f32.xlu1 %v82_v13  ;;  %v3630_v13 = vmov 1966171168  }
  0xa2   :  { %v114_v14 = vunpack.c.l.s4 %v3630_v13 }
 0x126   :  { %v81_v17 = vpop.xlane.xlu1 %80 }
 0x127   :  { %v85_v18 = vmul.f32 0.03125, %v81_v17  ;;  %v109_v17 = vld [vmem:[%s4393_s20] sm:$0x3] }
 0x129   :  { %v87_v19 = vadd.f32 1e-12, %v85_v18  ;;  %v110_v18 = vsub.f32 1.0, %v109_v17 }
 0x12a   :  { %v84_v20 = vpop.xlane.xlu1 %83 }
 0x12b   :  { %3509 = vrsqrt.f32 %v87_v19  ;;  %v86_v21 = vmul.f32 0.03125, %v84_v20  ;;  %v115_v19 = vunpack.c.0.s8 %v114_v14  ;;  %v117_v20 = vshrl.u32 %v116_v16, 7 }
 0x12d   :  { %v88_v22 = vadd.f32 1e-12, %v86_v21  ;;  %v111_v21 = vmul.f32 -10000.0, %v110_v18 }
 0x12f   :  { %3511 = vrsqrt.f32 %v88_v22  ;;  %v118_v22 = vsub.s32 %v115_v19, %v117_v20 }
 0x138   :  { %v3510_v23 = vpop.eup %3509 }
 0x139   :  { %v91_v24 = vmul.f32 %v3510_v23, %v75_v6  ;;  %v119_v23 = vrot.slane %v111_v21, %v118_v22 }
 0x13b   :  { %v99_v28 = vmul.f32 %v2938_v25, %v91_v24  ;;  %v120_v24 = vcombine.high %v119_v23, %v119_v23 }
 0x13c   :  { %v3512_v26 = vpop.eup %3511 }
 0x13d   :  { %v92_v27 = vmul.f32 %v3512_v26, %v76_v10  ;;  %v3760_v31 = vadd.f32 %v2939_v29, %v99_v28  ;;  %v657_v26 = vsub.s32 0, %v117_v20 }
 0x13f   :  { %v100_v30 = vmul.f32 %v2938_v25, %v92_v27  ;;  %v134_v25 = vrot.slane %v120_v24, %v118_v22  ;;  %v127_v27 = vrot.slane %v119_v23, %v118_v22 }
 0x141   :  { %v3762_v32 = vadd.f32 %v2939_v29, %v100_v30  ;;  %v3857_v28 = vrot.slane %v134_v25, %v657_v26 }
 0x143   :  { %v163_v33 = vpack.c.bf16 %v3762_v32, %v3760_v31 }
 0x145   :  { %3148 = vmatmul.mubr.msk.bf16.vlgmr.msra.gmra.mxu0 %vm65_vm0, %v163_v33 }
 0x146   :  { %3159 = vmatprep.mubr.msk.bf16.mxu0 %vm3624_vm1, %v3623_v15 }
 0x205   :  { %v219_v34 = vpop.f32.mrf.mxu0 }
 0x206   :  { %v220_v38 = vadd.f32 %v2940_v35, %v219_v34  ;;  %v3859_v34 = vrot.slane %v127_v27, %v657_v26 }
 0x207   :  { %v3149_v36 = vpop.f32.mrf.mxu0 }
 0x208   :  { %v246_v43 = vpack.c.bf16 %v220_v38, %v220_v38 }
 0x209   :  { %v222_v37 = vpop.f32.mrf.mxu0 }
 0x20a   :  { %v223_v39 = vadd.f32 %v2940_v35, %v222_v37 }
 0x20b   :  { %v3150_v40 = vpop.f32.mrf.mxu0 }
 0x20c   :  { %v3432_v41 = vpack.i.bf16 %v223_v39, %v220_v38  ;;  %v3774_v42 = vpack.c.bf16 %v223_v39, %v223_v39 }
 0x20e   :  { %3433 = vrot.lane.b32.xlu1 %v3432_v41, %s3625_s3  ;;  %3428 = vrot.lane.b32.xlu0 %v3432_v41, %s3626_s28 }
 0x212   :  { %3438 = vrot.lane.b32.xlu1 %v3432_v41, %s3627_s29  ;;  %305 = vrot.lane.b32.xlu0 %v3774_v42, %s3628_s30 }
 0x216   :  { %255 = vrot.lane.b32.xlu1 %v246_v43, %s3628_s30 }
 0x280   :  { %v3434_v44 = vpop.permute.xlu1 %3433  ;;  %v3429_v45 = vpop.permute.xlu0 %3428 }
 0x281   :  { %v3431_v46 = vunpack.i.h.bf16 %v3429_v45  ;;  %v3430_v47 = vunpack.i.l.bf16 %v3429_v45  ;;  %v3436_v48 = vunpack.i.h.bf16 %v3434_v44  ;;  %v3435_v49 = vunpack.i.l.bf16 %v3434_v44 }
 0x283   :  { %v3780_v50 = vpack.c.bf16 %v3431_v46, %v3431_v46  ;;  %v3782_v51 = vpack.c.bf16 %v3430_v47, %v3430_v47  ;;  %v3789_v55 = vpack.c.bf16 %v3436_v48, %v3436_v48  ;;  %v3791_v56 = vpack.c.bf16 %v3435_v49, %v3435_v49 }
 0x284   :  { %v3439_v52 = vpop.permute.xlu1 %3438  ;;  %v306_v53 = vpop.permute.xlu0 %305 }
 0x285   :  { %v311_v54 = vsel %vm257_vm2, %v306_v53, 0  ;;  %354 = vrot.lane.b32.xlu1 %v3782_v51, %s3628_s30  ;;  %403 = vrot.lane.b32.xlu0 %v3780_v50, %s3628_s30  ;;  %v3441_v57 = vunpack.i.h.bf16 %v3439_v52  ;;  %v3440_v58 = vunpack.i.l.bf16 %v3439_v52 }
 0x286   :  { %3158 = vmatpush3.bf16.xpose.msra.mxu0 %v311_v54 }
 0x287   :  { %3169 = vmatprep.subr.bf16.mxu0 %v3623_v15  ;;  %v3799_v61 = vpack.c.bf16 %v3441_v57, %v3441_v57  ;;  %v3801_v62 = vpack.c.bf16 %v3440_v58, %v3440_v58 }
 0x288   :  { %v256_v59 = vpop.permute.xlu1 %255 }
 0x289   :  { %452 = vrot.lane.b32.xlu1 %v3791_v56, %s3628_s30  ;;  %501 = vrot.lane.b32.xlu0 %v3789_v55, %s3628_s30  ;;  %v262_v60 = vsel %vm257_vm2, %v256_v59, 0 }
 0x28a   :  { %3152 = vmatpush3.bf16.xpose.msra.mxu1 %v262_v60 }
 0x28b   :  { %3163 = vmatprep.subr.bf16.mxu1 %v3623_v15 }
 0x28d   :  { %550 = vrot.lane.b32.xlu1 %v3801_v62, %s3628_s30  ;;  %599 = vrot.lane.b32.xlu0 %v3799_v61, %s3628_s30 }
 0x28e   :  { %3160 = vmatmul.mubr.msk.bf16.vlgmr.msra.gmra.mxu0 %vm257_vm2, %v3774_v42 }
 0x28f   :  { %3171 = vmatprep.mubr.msk.bf16.mxu0 %vm3624_vm1, %v3623_v15 }
 0x291   :  { %3154 = vmatmul.mubr.msk.bf16.vlgmr.msra.gmra.mxu1 %vm257_vm2, %v246_v43  ;;  %769 = vrot.lane.b32.xlu1 %v246_v43, %s3629_s0 }
 0x292   :  { %3165 = vmatprep.mubr.msk.bf16.mxu1 %vm3624_vm1, %v3623_v15 }
 0x2f7   :  { %v355_v63 = vpop.permute.xlu1 %354  ;;  %v404_v0 = vpop.permute.xlu0 %403 }
 0x2f8   :  { %v360_v1 = vsel %vm257_vm2, %v355_v63, 0  ;;  %v409_v2 = vsel %vm257_vm2, %v404_v0, 0 }
 0x2f9   :  { %3164 = vmatpush3.bf16.xpose.msra.mxu1 %v360_v1  ;;  %3170 = vmatpush3.bf16.xpose.msra.mxu0 %v409_v2 }
 0x2fa   :  { %3175 = vmatprep.subr.bf16.mxu1 %v3623_v15  ;;  %3181 = vmatprep.subr.bf16.mxu0 %v3623_v15 }
 0x2fb   :  { %v453_v3 = vpop.permute.xlu1 %452  ;;  %v502_v4 = vpop.permute.xlu0 %501 }
 0x2fc   :  { %v458_v5 = vsel %vm257_vm2, %v453_v3, 0  ;;  %v507_v6 = vsel %vm257_vm2, %v502_v4, 0 }
 0x2ff   :  { %v551_v7 = vpop.permute.xlu1 %550  ;;  %v600_v8 = vpop.permute.xlu0 %599 }
 0x300   :  { %3166 = vmatmul.mubr.msk.bf16.vlgmr.msra.gmra.mxu1 %vm257_vm2, %v3782_v51  ;;  %3172 = vmatmul.mubr.msk.bf16.vlgmr.msra.gmra.mxu0 %vm257_vm2, %v3780_v50  ;;  %v556_v9 = vsel %vm257_vm2, %v551_v7, 0  ;;  %v605_v10 = vsel %vm257_vm2, %v600_v8, 0 }
 0x301   :  { %3176 = vmatpush3.bf16.xpose.msra.mxu1 %v458_v5  ;;  %3182 = vmatpush3.bf16.xpose.msra.mxu0 %v507_v6 }
 0x302   :  { %3177 = vmatprep.mubr.msk.bf16.mxu1 %vm3624_vm1, %v3623_v15  ;;  %3183 = vmatprep.mubr.msk.bf16.mxu0 %vm3624_vm1, %v3623_v15 }
 0x303   :  { %3187 = vmatprep.subr.bf16.mxu1 %v3623_v15  ;;  %3193 = vmatprep.subr.bf16.mxu0 %v3623_v15  ;;  %v770_v11 = vpop.permute.xlu1 %769 }
 0x304   :  { %v776_v12 = vsel %vm774_vm3, %v770_v11, 0 }
 0x308   :  { %3178 = vmatmul.mubr.msk.bf16.vlgmr.msra.gmra.mxu1 %vm257_vm2, %v3791_v56  ;;  %3184 = vmatmul.mubr.msk.bf16.vlgmr.msra.gmra.mxu0 %vm257_vm2, %v3789_v55 }
 0x309   :  { %3188 = vmatpush3.bf16.xpose.msra.mxu1 %v556_v9  ;;  %3194 = vmatpush3.bf16.xpose.msra.mxu0 %v605_v10 }
 0x30a   :  { %3189 = vmatprep.mubr.msk.bf16.mxu1 %vm3624_vm1, %v3623_v15  ;;  %3195 = vmatprep.mubr.msk.bf16.mxu0 %vm3624_vm1, %v3623_v15 }
 0x30b   :  { %3199 = vmatprep.subr.bf16.mxu1 %v3623_v15  ;;  %3205 = vmatprep.subr.bf16.mxu0 %v3623_v15 }
 0x310   :  { %3190 = vmatmul.mubr.msk.bf16.vlgmr.msra.gmra.mxu1 %vm257_vm2, %v3801_v62  ;;  %3196 = vmatmul.mubr.msk.bf16.vlgmr.msra.gmra.mxu0 %vm257_vm2, %v3799_v61 }
 0x311   :  { %3200 = vmatpush3.bf16.msra.mxu1 %v776_v12  ;;  %3207 = vmatprep.mubr.msk.bf16.mxu0 %vm3624_vm1, %v3623_v15 }
 0x312   :  { %3201 = vmatprep.mubr.msk.bf16.mxu1 %vm3624_vm1, %v3623_v15  ;;  %3211 = vmatprep.subr.bf16.mxu1 %v3623_v15 }
 0x34e   :  { %v347_v29 = vpop.f32.mrf.mxu0 }
 0x34f   :  { %v648_v30 = vmul.f32 0.35355338, %v347_v29 }
 0x350   :  { %v3161_v33 = vpop.f32.mrf.mxu0 }
 0x351   :  { %v298_v35 = vpop.f32.mrf.mxu1  ;;  %v3862_v36 = vadd.f32 %v3857_v28, %v648_v30 }
 0x352   :  { %v647_v37 = vmul.f32 0.35355338, %v298_v35  ;;  %v350_v38 = vpop.f32.mrf.mxu0 }
 0x353   :  { %v3155_v39 = vpop.f32.mrf.mxu1  ;;  %v676_v40 = vsel %vm257_vm2, %v3862_v36, -inf }
 0x354   :  { %677 = vmax.xlane.f32.xlu0 %v676_v40  ;;  %v3162_v41 = vpop.f32.mrf.mxu0  ;;  %v665_v43 = vadd.f32 %v3859_v34, %v647_v37 }
 0x355   :  { %v301_v44 = vpop.f32.mrf.mxu1 }
 0x356   :  { %v673_v45 = vsel %vm257_vm2, %v665_v43, -inf }
 0x357   :  { %v3156_v46 = vpop.f32.mrf.mxu1  ;;  %674 = vmax.xlane.f32.xlu1 %v673_v45 }
 0x3c0   :  { %v396_v47 = vpop.f32.mrf.mxu1  ;;  %v445_v48 = vpop.f32.mrf.mxu0 }
 0x3c1   :  { %v649_v49 = vmul.f32 0.35355338, %v396_v47  ;;  %v650_v52 = vmul.f32 0.35355338, %v445_v48 }
 0x3c2   :  { %v3167_v53 = vpop.f32.mrf.mxu1  ;;  %v3173_v54 = vpop.f32.mrf.mxu0 }
 0x3c3   :  { %v667_v57 = vadd.f32 %v3859_v34, %v649_v49  ;;  %v668_v63 = vadd.f32 %v3857_v28, %v650_v52 }
 0x3c4   :  { %v399_v58 = vpop.f32.mrf.mxu1  ;;  %v448_v59 = vpop.f32.mrf.mxu0 }
 0x3c5   :  { %v679_v60 = vsel %vm257_vm2, %v667_v57, -inf  ;;  %v682_v6 = vsel %vm257_vm2, %v668_v63, -inf }
 0x3c6   :  { %v3168_v0 = vpop.f32.mrf.mxu1  ;;  %680 = vmax.xlane.f32.xlu0 %v679_v60  ;;  %v3174_v1 = vpop.f32.mrf.mxu0 }
 0x3c8   :  { %v494_v2 = vpop.f32.mrf.mxu1  ;;  %v543_v3 = vpop.f32.mrf.mxu0 }
 0x3c9   :  { %v651_v4 = vmul.f32 0.35355338, %v494_v2  ;;  %v652_v5 = vmul.f32 0.35355338, %v543_v3 }
 0x3ca   :  { %v3179_v7 = vpop.f32.mrf.mxu1  ;;  %683 = vmax.xlane.f32.xlu0 %v682_v6  ;;  %v3185_v8 = vpop.f32.mrf.mxu0 }
 0x3cb   :  { %v669_v9 = vadd.f32 %v3859_v34, %v651_v4  ;;  %v3874_v10 = vadd.f32 %v3857_v28, %v652_v5 }
 0x3cc   :  { %v497_v11 = vpop.f32.mrf.mxu1  ;;  %v546_v12 = vpop.f32.mrf.mxu0 }
 0x3cd   :  { %v685_v13 = vsel %vm257_vm2, %v669_v9, -inf  ;;  %v688_v14 = vsel %vm257_vm2, %v3874_v10, -inf }
 0x3ce   :  { %686 = vmax.xlane.f32.xlu1 %v685_v13  ;;  %v3180_v16 = vpop.f32.mrf.mxu1  ;;  %689 = vmax.xlane.f32.xlu0 %v688_v14  ;;  %v3186_v17 = vpop.f32.mrf.mxu0 }
 0x3d0   :  { %v592_v18 = vpop.f32.mrf.mxu1  ;;  %v641_v19 = vpop.f32.mrf.mxu0 }
 0x3d1   :  { %v653_v20 = vmul.f32 0.35355338, %v592_v18  ;;  %v654_v21 = vmul.f32 0.35355338, %v641_v19 }
 0x3d2   :  { %v3191_v22 = vpop.f32.mrf.mxu1  ;;  %v3197_v23 = vpop.f32.mrf.mxu0 }
 0x3d3   :  { %v671_v24 = vadd.f32 %v3859_v34, %v653_v20  ;;  %v3881_v25 = vadd.f32 %v3857_v28, %v654_v21 }
 0x3d4   :  { %v595_v26 = vpop.f32.mrf.mxu1  ;;  %v644_v27 = vpop.f32.mrf.mxu0 }
 0x3d5   :  { %v691_v29 = vsel %vm257_vm2, %v671_v24, -inf  ;;  %v694_v30 = vsel %vm257_vm2, %v3881_v25, -inf }
 0x3d6   :  { %692 = vmax.xlane.f32.xlu1 %v691_v29  ;;  %v3192_v33 = vpop.f32.mrf.mxu1  ;;  %695 = vmax.xlane.f32.xlu0 %v694_v30  ;;  %v3198_v35 = vpop.f32.mrf.mxu0 }
 0x3dd   :  { %v678_v37 = vpop.xlane.xlu0 %677 }
 0x3de   :  { %v698_v38 = vsub.f32 %v3862_v36, %v678_v37 }
 0x3e0   :  { %v675_v39 = vpop.xlane.xlu1 %674  ;;  %v707_v40 = vmul.f32 1.442695, %v698_v38 }
 0x3e1   :  { %v697_v41 = vsub.f32 %v665_v43, %v675_v39 }
 0x3e2   :  { %3513 = vpow2.f32 %v707_v40 }
 0x3e3   :  { %v705_v44 = vmul.f32 1.442695, %v697_v41 }
 0x3e5   :  { %3515 = vpow2.f32 %v705_v44 }
 0x3e7   :  { %866 = vrot.lane.b32.xlu1 %v3782_v51, %s3629_s0 }
 0x3eb   :  { %914 = vrot.lane.b32.xlu1 %v3780_v50, %s3629_s0 }
 0x3ec   :  { %818 = vrot.lane.b32.xlu0 %v3774_v42, %s3629_s0 }
 0x3ef   :  { %v3514_v45 = vpop.eup %3513 }
 0x3f0   :  { %v724_v46 = vsel %vm257_vm2, %v3514_v45, 0.0 }
 0x3f2   :  { %v3894_v47 = vpop.eup %3515 }
 0x3f3   :  { %v721_v50 = vsel %vm257_vm2, %v3894_v47, 0.0 }
 0x40b   :  { %725 = vadd.xlane.f32.xlu0 %v724_v46 }
 0x40f   :  { %722 = vadd.xlane.f32.xlu1 %v721_v50 }
 0x420   :  { %962 = vrot.lane.b32.xlu1 %v3791_v56, %s3629_s0 }
 0x44f   :  { %v681_v42 = vpop.xlane.xlu0 %680 }
 0x450   :  { %v699_v51 = vsub.f32 %v667_v57, %v681_v42 }
 0x452   :  { %v709_v36 = vmul.f32 1.442695, %v699_v51 }
 0x453   :  { %v684_v43 = vpop.xlane.xlu0 %683 }
 0x454   :  { %3517 = vpow2.f32 %v709_v36  ;;  %v700_v48 = vsub.f32 %v668_v63, %v684_v43 }
 0x456   :  { %v711_v49 = vmul.f32 1.442695, %v700_v48 }
 0x457   :  { %v687_v52 = vpop.xlane.xlu1 %686  ;;  %v690_v58 = vpop.xlane.xlu0 %689 }
 0x458   :  { %3519 = vpow2.f32 %v711_v49  ;;  %v701_v53 = vsub.f32 %v669_v9, %v687_v52  ;;  %v702_v9 = vsub.f32 %v3874_v10, %v690_v58 }
 0x45a   :  { %v713_v54 = vmul.f32 1.442695, %v701_v53  ;;  %v715_v11 = vmul.f32 1.442695, %v702_v9 }
 0x45c   :  { %3521 = vpow2.f32 %v713_v54 }
 0x45f   :  { %v693_v59 = vpop.xlane.xlu1 %692  ;;  %v696_v60 = vpop.xlane.xlu0 %695 }
 0x460   :  { %v703_v0 = vsub.f32 %v671_v24, %v693_v59  ;;  %v704_v12 = vsub.f32 %v3881_v25, %v696_v60 }
 0x461   :  { %v3900_v1 = vpop.eup %3517 }
 0x462   :  { %v717_v2 = vmul.f32 1.442695, %v703_v0  ;;  %v727_v56 = vsel %vm257_vm2, %v3900_v1, 0.0  ;;  %v719_v13 = vmul.f32 1.442695, %v704_v12 }
 0x463   :  { %728 = vadd.xlane.f32.xlu1 %v727_v56  ;;  %v819_v57 = vpop.permute.xlu0 %818  ;;  %v867_v14 = vpop.permute.xlu1 %866 }
 0x464   :  { %3523 = vpow2.f32 %v717_v2  ;;  %v824_v63 = vsel %vm774_vm3, %v819_v57, 0  ;;  %v872_v27 = vsel %vm774_vm3, %v867_v14, 0 }
 0x465   :  { %v3905_v3 = vpop.eup %3519  ;;  %3206 = vmatpush3.bf16.msra.mxu0 %v824_v63  ;;  %3525 = vpow2.f32 %v715_v11 }
 0x466   :  { %v730_v4 = vsel %vm257_vm2, %v3905_v3, 0.0  ;;  %3217 = vmatprep.subr.bf16.mxu0 %v3623_v15  ;;  %3527 = vpow2.f32 %v719_v13 }
 0x467   :  { %731 = vadd.xlane.f32.xlu0 %v730_v4  ;;  %v915_v16 = vpop.permute.xlu1 %914 }
 0x468   :  { %v920_v24 = vsel %vm774_vm3, %v915_v16, 0 }
 0x469   :  { %v3910_v5 = vpop.eup %3521 }
 0x46a   :  { %v733_v6 = vsel %vm257_vm2, %v3910_v5, 0.0 }
 0x46b   :  { %734 = vadd.xlane.f32.xlu1 %v733_v6 }
 0x471   :  { %v3914_v7 = vpop.eup %3523 }
 0x472   :  { %v739_v8 = vsel %vm257_vm2, %v3914_v7, 0.0  ;;  %v3924_v18 = vpop.eup %3525 }
 0x473   :  { %740 = vadd.xlane.f32.xlu1 %v739_v8  ;;  %v3928_v10 = vpop.eup %3527 }
 0x47d   :  { %1010 = vrot.lane.b32.xlu0 %v3789_v55, %s3629_s0  ;;  %v736_v55 = vsel %vm257_vm2, %v3924_v18, 0.0 }
 0x484   :  { %1058 = vrot.lane.b32.xlu1 %v3801_v62, %s3629_s0  ;;  %v742_v62 = vsel %vm257_vm2, %v3928_v10, 0.0 }
 0x494   :  { %v726_v17 = vpop.xlane.xlu0 %725 }
 0x495   :  { %3529 = vrcp.f32 %v726_v17 }
 0x498   :  { %v723_v19 = vpop.xlane.xlu1 %722 }
 0x499   :  { %3531 = vrcp.f32 %v723_v19 }
 0x49c   :  { %737 = vadd.xlane.f32.xlu0 %v736_v55  ;;  %v963_v29 = vpop.permute.xlu1 %962 }
 0x49d   :  { %v968_v44 = vsel %vm774_vm3, %v963_v29, 0 }
 0x4a0   :  { %743 = vadd.xlane.f32.xlu0 %v742_v62 }
 0x4a2   :  { %v3530_v20 = vpop.eup %3529 }
 0x4a3   :  { %v754_v21 = vmul.f32 %v3530_v20, %v3514_v45 }
 0x4a5   :  { %v762_v22 = vpack.c.bf16 %v754_v21, %v754_v21 }
 0x4a6   :  { %v3532_v23 = vpop.eup %3531 }
 0x4a7   :  { %3208 = vmatmul.mubr.msk.bf16.vlgmr.msra.gmra.mxu0 %vm257_vm2, %v762_v22  ;;  %v753_v25 = vmul.f32 %v3532_v23, %v3894_v47 }
 0x4a8   :  { %3218 = vmatpush3.bf16.msra.mxu0 %v920_v24  ;;  %3219 = vmatprep.mubr.msk.bf16.mxu0 %vm3624_vm1, %v3623_v15 }
 0x4a9   :  { %v761_v26 = vpack.c.bf16 %v753_v25, %v753_v25  ;;  %3229 = vmatprep.subr.bf16.mxu0 %v3623_v15 }
 0x4ab   :  { %3202 = vmatmul.mubr.msk.bf16.vlgmr.msra.gmra.mxu1 %vm257_vm2, %v761_v26  ;;  %v3489_v26 = vld [vmem:[%s4374_s6 + $0x8] sm:$0xff]  }
 0x4ac   :  { %3212 = vmatpush3.bf16.msra.mxu1 %v872_v27  ;;  %3213 = vmatprep.mubr.msk.bf16.mxu1 %vm3624_vm1, %v3623_v15  ;;  %v3490_v27 = vld [vmem:[%s4374_s6] sm:$0xff]  }
 0x4ad   :  { %3223 = vmatprep.subr.bf16.mxu1 %v3623_v15 }
 0x4b6   :  { %1106 = vrot.lane.b32.xlu0 %v3799_v61, %s3629_s0 }
 0x4ec   :  { %v729_v30 = vpop.xlane.xlu1 %728 }
 0x4ed   :  { %3533 = vrcp.f32 %v729_v30 }
 0x4f0   :  { %v732_v33 = vpop.xlane.xlu0 %731 }
 0x4f1   :  { %3535 = vrcp.f32 %v732_v33 }
 0x4f4   :  { %v735_v35 = vpop.xlane.xlu1 %734  ;;  %v1011_v45 = vpop.permute.xlu0 %1010 }
 0x4f5   :  { %3537 = vrcp.f32 %v735_v35  ;;  %v1016_v50 = vsel %vm774_vm3, %v1011_v45, 0 }
 0x4fa   :  { %v3534_v37 = vpop.eup %3533 }
 0x4fb   :  { %v755_v38 = vmul.f32 %v3534_v37, %v3900_v1 }
 0x4fc   :  { %v741_v39 = vpop.xlane.xlu1 %740 }
 0x4fd   :  { %3539 = vrcp.f32 %v741_v39  ;;  %v763_v40 = vpack.c.bf16 %v755_v38, %v755_v38 }
 0x4fe   :  { %v3536_v41 = vpop.eup %3535 }
 0x4ff   :  { %3214 = vmatmul.mubr.msk.bf16.vlgmr.msra.gmra.mxu1 %vm257_vm2, %v763_v40  ;;  %v756_v61 = vmul.f32 %v3536_v41, %v3905_v3 }
 0x500   :  { %3224 = vmatpush3.bf16.msra.mxu1 %v968_v44  ;;  %3225 = vmatprep.mubr.msk.bf16.mxu1 %vm3624_vm1, %v3623_v15  ;;  %v1059_v51 = vpop.permute.xlu1 %1058 }
 0x501   :  { %v764_v46 = vpack.c.bf16 %v756_v61, %v756_v61  ;;  %3235 = vmatprep.subr.bf16.mxu1 %v3623_v15  ;;  %v1064_v43 = vsel %vm774_vm3, %v1059_v51, 0 }
 0x502   :  { %v3538_v47 = vpop.eup %3537 }
 0x503   :  { %3220 = vmatmul.mubr.msk.bf16.vlgmr.msra.gmra.mxu0 %vm257_vm2, %v764_v46  ;;  %v757_v42 = vmul.f32 %v3538_v47, %v3910_v5 }
 0x504   :  { %3230 = vmatpush3.bf16.msra.mxu0 %v1016_v50  ;;  %3231 = vmatprep.mubr.msk.bf16.mxu0 %vm3624_vm1, %v3623_v15 }
 0x505   :  { %v765_v36 = vpack.c.bf16 %v757_v42, %v757_v42  ;;  %3241 = vmatprep.subr.bf16.mxu0 %v3623_v15 }
 0x507   :  { %3226 = vmatmul.mubr.msk.bf16.vlgmr.msra.gmra.mxu1 %vm257_vm2, %v765_v36 }
 0x508   :  { %3236 = vmatpush3.bf16.msra.mxu1 %v1064_v43  ;;  %3237 = vmatprep.mubr.msk.bf16.mxu1 %vm3624_vm1, %v3623_v15 }
 0x509   :  { %3247 = vmatprep.subr.bf16.mxu1 %v3623_v15 }
 0x50a   :  { %v3540_v48 = vpop.eup %3539 }
 0x50b   :  { %v759_v49 = vmul.f32 %v3540_v48, %v3914_v7 }
 0x50d   :  { %v767_v52 = vpack.c.bf16 %v759_v49, %v759_v49 }
 0x50f   :  { %3238 = vmatmul.mubr.msk.bf16.vlgmr.msra.gmra.mxu1 %vm257_vm2, %v767_v52 }
 0x510   :  { %3251 = vmatprep.mubr.msk.bf16.mxu1 %vm3624_vm1, %v3623_v15  ;;  %3248 = vmatpush3.bf16.msra.mxu1 %v3489_v26 }
 0x511   :  { %3249 = vmatprep.subr.bf16.mxu1 %v3623_v15 }
 0x514   :  { %3250 = vmatpush3.bf16.msra.mxu1 %v3490_v27 }
 0x515   :  { %3263 = vmatprep.subr.bf16.mxu1 %v3623_v15 }
 0x525   :  { %v738_v53 = vpop.xlane.xlu0 %737 }
 0x526   :  { %3541 = vrcp.f32 %v738_v53 }
 0x529   :  { %v744_v54 = vpop.xlane.xlu0 %743 }
 0x52a   :  { %3543 = vrcp.f32 %v744_v54 }
 0x52d   :  { %v1107_v60 = vpop.permute.xlu0 %1106 }
 0x52e   :  { %v1112_v2 = vsel %vm774_vm3, %v1107_v60, 0  ;;  %v2960_v60 = vld [vmem:[%s4375_s7] ss:$0 sm:$0xff] }
 0x533   :  { %v3542_v58 = vpop.eup %3541 }
 0x534   :  { %v758_v59 = vmul.f32 %v3542_v58, %v3924_v18 }
 0x536   :  { %v766_v0 = vpack.c.bf16 %v758_v59, %v758_v59 }
 0x537   :  { %v3544_v1 = vpop.eup %3543 }
 0x538   :  { %3232 = vmatmul.mubr.msk.bf16.vlgmr.msra.gmra.mxu0 %vm257_vm2, %v766_v0  ;;  %v760_v56 = vmul.f32 %v3544_v1, %v3928_v10 }
 0x539   :  { %3242 = vmatpush3.bf16.msra.mxu0 %v1112_v2  ;;  %3243 = vmatprep.mubr.msk.bf16.mxu0 %vm3624_vm1, %v3623_v15 }
 0x53a   :  { %3255 = vmatprep.subr.bf16.mxu0 %v3623_v15  ;;  %v768_v57 = vpack.c.bf16 %v760_v56, %v760_v56 }
 0x540   :  { %3244 = vmatmul.mubr.msk.bf16.vlgmr.msra.gmra.mxu0 %vm257_vm2, %v768_v57 }
 0x541   :  { %3259 = vmatprep.mubr.msk.bf16.mxu0 %vm3624_vm1, %v3623_v15 }
 0x567   :  { %v860_v63 = vpop.f32.mrf.mxu0 }
 0x569   :  { %v3209_v3 = vpop.f32.mrf.mxu0 }
 0x56b   :  { %v812_v4 = vpop.f32.mrf.mxu1  ;;  %v863_v5 = vpop.f32.mrf.mxu0 }
 0x56d   :  { %v3203_v6 = vpop.f32.mrf.mxu1  ;;  %v3210_v7 = vpop.f32.mrf.mxu0 }
 0x56f   :  { %v815_v8 = vpop.f32.mrf.mxu1 }
 0x571   :  { %v3204_v9 = vpop.f32.mrf.mxu1 }
 0x5bf   :  { %v908_v11 = vpop.f32.mrf.mxu1 }
 0x5c1   :  { %v3215_v12 = vpop.f32.mrf.mxu1 }
 0x5c3   :  { %v911_v13 = vpop.f32.mrf.mxu1  ;;  %v956_v14 = vpop.f32.mrf.mxu0 }
 0x5c4   :  { %v3442_v16 = vpack.i.bf16 %v956_v14, %v908_v11 }
 0x5c5   :  { %v3216_v17 = vpop.f32.mrf.mxu1  ;;  %v3221_v18 = vpop.f32.mrf.mxu0 }
 0x5c6   :  { %3443 = vrot.lane.b32.xlu1 %v3442_v16, %s3631_s21  ;;  %v3492_v18 = vld [vmem:[%s4378_s10] sm:$0xff]  }
 0x5c7   :  { %v959_v19 = vpop.f32.mrf.mxu0  ;;  %v1004_v55 = vpop.f32.mrf.mxu1 }
 0x5c9   :  { %v3222_v10 = vpop.f32.mrf.mxu0  ;;  %v3227_v62 = vpop.f32.mrf.mxu1 }
 0x5cb   :  { %v1007_v20 = vpop.f32.mrf.mxu1 }
 0x5cd   :  { %v3228_v21 = vpop.f32.mrf.mxu1 }
 0x5cf   :  { %v1100_v22 = vpop.f32.mrf.mxu1 }
 0x5d1   :  { %v3239_v23 = vpop.f32.mrf.mxu1 }
 0x5d3   :  { %v1103_v24 = vpop.f32.mrf.mxu1 }
 0x5d4   :  { %v2964_v24 = vld [vmem:[%s4376_s8] ss:$0 sm:$0xff] }
 0x5d5   :  { %v3240_v25 = vpop.f32.mrf.mxu1 }
 0x5f8   :  { %v1052_v29 = vpop.f32.mrf.mxu0 }
 0x5f9   :  { %v3447_v30 = vpack.i.bf16 %v1052_v29, %v1004_v55  ;;  %v2965_v29 = vld [vmem:[%s4377_s9] ss:$0 sm:$0xff] }
 0x5fa   :  { %v3233_v33 = vpop.f32.mrf.mxu0 }
 0x5fb   :  { %3448 = vrot.lane.b32.xlu0 %v3447_v30, %s3632_s25 }
 0x5fc   :  { %v1055_v35 = vpop.f32.mrf.mxu0 }
 0x5fe   :  { %v3234_v37 = vpop.f32.mrf.mxu0 }
 0x600   :  { %v1148_v38 = vpop.f32.mrf.mxu0 }
 0x601   :  { %v3452_v39 = vpack.i.bf16 %v1148_v38, %v1100_v22  ;;  %v3493_v38 = vld [vmem:[%s4380_s12 + $0x18] sm:$0xff]  }
 0x602   :  { %v3245_v40 = vpop.f32.mrf.mxu0 }
 0x603   :  { %3453 = vrot.lane.b32.xlu1 %v3452_v39, %s3633_s26  ;;  %v3494_v39 = vld [vmem:[%s4380_s12 + $0x10] sm:$0xff]   ;;  %v3495_v40 = vld [vmem:[%s4380_s12 + $0x8] sm:$0xff]  }
 0x604   :  { %v1151_v41 = vpop.f32.mrf.mxu0 }
 0x605   :  { %v3496_v41 = vld [vmem:[%s4380_s12] sm:$0xff]  }
 0x606   :  { %v3246_v44 = vpop.f32.mrf.mxu0 }
 0x607   :  { %v2966_v44 = vld [vmem:[%s4379_s11] ss:$0 sm:$0xff] }
 0x638   :  { %v3444_v61 = vpop.permute.xlu1 %3443 }
 0x639   :  { %v3446_v46 = vunpack.i.h.bf16 %v3444_v61  ;;  %v3445_v47 = vunpack.i.l.bf16 %v3444_v61 }
 0x63b   :  { %v1179_v36 = vsel %vm257_vm2, %v860_v63, %v3446_v46  ;;  %v1178_v43 = vsel %vm257_vm2, %v812_v4, %v3445_v47 }
 0x66d   :  { %v3449_v45 = vpop.permute.xlu0 %3448 }
 0x66e   :  { %v3451_v50 = vunpack.i.h.bf16 %v3449_v45  ;;  %v3450_v42 = vunpack.i.l.bf16 %v3449_v45 }
 0x670   :  { %v1182_v52 = vsel %vm1180_vm4, %v1179_v36, %v3451_v50  ;;  %v1181_v53 = vsel %vm1180_vm4, %v1178_v43, %v3450_v42 }
 0x675   :  { %v3454_v51 = vpop.permute.xlu1 %3453 }
 0x676   :  { %v3456_v48 = vunpack.i.h.bf16 %v3454_v51  ;;  %v3455_v49 = vunpack.i.l.bf16 %v3454_v51 }
 0x678   :  { %v1185_v54 = vsel %vm1183_vm5, %v1182_v52, %v3456_v48  ;;  %v1184_v58 = vsel %vm1183_vm5, %v1181_v53, %v3455_v49 }
 0x679   :  { %v1186_v59 = vpack.c.bf16 %v1185_v54, %v1184_v58 }
 0x67b   :  { %3252 = vmatmul.mubr.msk.bf16.vlgmr.msra.gmra.mxu1 %vm65_vm0, %v1186_v59 }
 0x67c   :  { %3271 = vmatprep.mubr.msk.bf16.mxu1 %vm3624_vm1, %v3623_v15  ;;  %3264 = vmatpush3.bf16.msra.mxu1 %v3493_v38  ;;  %v2976_v38 = vld [vmem:[%s4382_s14] ss:$0 sm:$0xff] }
 0x67d   :  { %3265 = vmatprep.subr.bf16.mxu1 %v3623_v15 }
 0x680   :  { %3266 = vmatpush3.bf16.msra.mxu1 %v3494_v39 }
 0x681   :  { %3267 = vmatprep.subr.bf16.mxu1 %v3623_v15 }
 0x684   :  { %3268 = vmatpush3.bf16.msra.mxu1 %v3495_v40 }
 0x685   :  { %3269 = vmatprep.subr.bf16.mxu1 %v3623_v15 }
 0x688   :  { %3270 = vmatpush3.bf16.msra.mxu1 %v3496_v41 }
 0x689   :  { %3289 = vmatprep.subr.bf16.mxu1 %v3623_v15 }
 0x73b   :  { %v1242_v0 = vpop.f32.mrf.mxu1 }
 0x73c   :  { %v1243_v1 = vadd.f32 %v2960_v60, %v1242_v0 }
 0x73d   :  { %v3253_v2 = vpop.f32.mrf.mxu1 }
 0x73e   :  { %v1249_v56 = vadd.f32 %v1243_v1, %v3760_v31 }
 0x73f   :  { %v1245_v57 = vpop.f32.mrf.mxu1 }
 0x740   :  { %v1246_v63 = vadd.f32 %v2960_v60, %v1245_v57  ;;  %v1251_v3 = vsel %vm65_vm0, %v1249_v56, 0.0 }
 0x741   :  { %1252 = vadd.xlane.f32.xlu0 %v1251_v3  ;;  %v3254_v4 = vpop.f32.mrf.mxu1 }
 0x742   :  { %v1250_v5 = vadd.f32 %v1246_v63, %v3762_v32  ;;  %v3491_v32 = vld [vmem:[%s4378_s10 + $0x8] sm:$0xff]  }
 0x743   :  { %3256 = vmatpush3.bf16.msra.mxu0 %v3491_v32 }
 0x744   :  { %v1254_v6 = vsel %vm65_vm0, %v1250_v5, 0.0  ;;  %3257 = vmatprep.subr.bf16.mxu0 %v3623_v15 }
 0x745   :  { %1255 = vadd.xlane.f32.xlu1 %v1254_v6 }
 0x747   :  { %3258 = vmatpush3.bf16.msra.mxu0 %v3492_v18 }
 0x748   :  { %3275 = vmatprep.subr.bf16.mxu0 %v3623_v15 }
 0x7ca   :  { %v1253_v7 = vpop.xlane.xlu0 %1252 }
 0x7cb   :  { %v1257_v8 = vmul.f32 0.03125, %v1253_v7 }
 0x7cd   :  { %v1259_v9 = vsub.f32 %v1249_v56, %v1257_v8 }
 0x7ce   :  { %v1256_v11 = vpop.xlane.xlu1 %1255 }
 0x7cf   :  { %v1258_v12 = vmul.f32 0.03125, %v1256_v11  ;;  %v1261_v13 = vmul.f32 %v1259_v9, %v1259_v9 }
 0x7d1   :  { %v1260_v14 = vsub.f32 %v1250_v5, %v1258_v12  ;;  %v1263_v31 = vsel %vm65_vm0, %v1261_v13, 0.0  ;;  %v2970_v5 = vld [vmem:[%s4381_s13] ss:$0 sm:$0xff] }
 0x7d2   :  { %1264 = vadd.xlane.f32.xlu0 %v1263_v31 }
 0x7d3   :  { %v1262_v16 = vmul.f32 %v1260_v14, %v1260_v14 }
 0x7d5   :  { %v1266_v17 = vsel %vm65_vm0, %v1262_v16, 0.0 }
 0x7d6   :  { %1267 = vadd.xlane.f32.xlu0 %v1266_v17 }
 0x85b   :  { %v1265_v19 = vpop.xlane.xlu0 %1264 }
 0x85c   :  { %v1269_v55 = vmul.f32 0.03125, %v1265_v19 }
 0x85e   :  { %v1271_v10 = vadd.f32 1e-12, %v1269_v55 }
 0x85f   :  { %v1268_v62 = vpop.xlane.xlu0 %1267 }
 0x860   :  { %3545 = vrsqrt.f32 %v1271_v10  ;;  %v1270_v20 = vmul.f32 0.03125, %v1268_v62 }
 0x862   :  { %v1272_v21 = vadd.f32 1e-12, %v1270_v20 }
 0x864   :  { %3547 = vrsqrt.f32 %v1272_v21 }
 0x86d   :  { %v3546_v22 = vpop.eup %3545 }
 0x86e   :  { %v1275_v23 = vmul.f32 %v3546_v22, %v1259_v9 }
 0x870   :  { %v1283_v27 = vmul.f32 %v2964_v24, %v1275_v23  ;;  %v3497_v23 = vld [vmem:[%s4372_s4 + $0x18] sm:$0xff]  }
 0x871   :  { %v3548_v25 = vpop.eup %3547 }
 0x872   :  { %v1276_v26 = vmul.f32 %v3548_v25, %v1260_v14  ;;  %v1291_v33 = vadd.f32 %v2965_v29, %v1283_v27 }
 0x874   :  { %v1284_v30 = vmul.f32 %v2964_v24, %v1276_v26  ;;  %v3498_v24 = vld [vmem:[%s4372_s4 + $0x10] sm:$0xff]  }
 0x876   :  { %v1292_v35 = vadd.f32 %v2965_v29, %v1284_v30 }
 0x878   :  { %v1293_v37 = vpack.c.bf16 %v1292_v35, %v1291_v33 }
 0x87a   :  { %3260 = vmatmul.mubr.msk.bf16.vlgmr.msra.gmra.mxu0 %vm65_vm0, %v1293_v37 }
 0x87b   :  { %3279 = vmatprep.mubr.msk.bf16.mxu0 %vm3624_vm1, %v3623_v15  ;;  %3276 = vmatpush3.bf16.msra.mxu0 %v3497_v23 }
 0x87c   :  { %3277 = vmatprep.subr.bf16.mxu0 %v3623_v15 }
 0x87f   :  { %3278 = vmatpush3.bf16.msra.mxu0 %v3498_v24 }
 0x880   :  { %3283 = vmatprep.subr.bf16.mxu0 %v3623_v15 }
 0x93a   :  { %v1349_v61 = vpop.f32.mrf.mxu0 }
 0x93b   :  { %v1350_v45 = vadd.f32 %v2966_v44, %v1349_v61 }
 0x93c   :  { %v3261_v46 = vpop.f32.mrf.mxu0 }
 0x93d   :  { %v1358_v47 = vmul.f32 0.044715, %v1350_v45  ;;  %v1356_v2 = vmul.f32 0.5, %v1350_v45 }
 0x93e   :  { %v1352_v50 = vpop.f32.mrf.mxu0 }
 0x93f   :  { %v1360_v42 = vmul.f32 %v1358_v47, %v1350_v45  ;;  %v1353_v51 = vadd.f32 %v2966_v44, %v1352_v50  ;;  %v2977_v44 = vld [vmem:[%s4383_s15] ss:$0 sm:$0xff] }
 0x940   :  { %v3262_v36 = vpop.f32.mrf.mxu0 }
 0x941   :  { %v1362_v43 = vmul.f32 %v1360_v42, %v1350_v45  ;;  %v1359_v48 = vmul.f32 0.044715, %v1353_v51  ;;  %v1357_v56 = vmul.f32 0.5, %v1353_v51  ;;  %v3006_v42 = vld [vmem:[%s4373_s5 + $0x1] ss:$0 sm:$0xff] }
 0x943   :  { %v1364_v49 = vadd.f32 %v1362_v43, %v1350_v45  ;;  %v1361_v52 = vmul.f32 %v1359_v48, %v1353_v51 }
 0x945   :  { %v1366_v53 = vmul.f32 0.7978846, %v1364_v49  ;;  %v1363_v54 = vmul.f32 %v1361_v52, %v1353_v51 }
 0x947   :  { %3549 = vtanh.f32 %v1366_v53  ;;  %v1365_v58 = vadd.f32 %v1363_v54, %v1353_v51 }
 0x949   :  { %v1367_v59 = vmul.f32 0.7978846, %v1365_v58 }
 0x94b   :  { %3551 = vtanh.f32 %v1367_v59 }
 0x954   :  { %v3550_v60 = vpop.eup %3549 }
 0x955   :  { %v1370_v0 = vadd.f32 1.0, %v3550_v60 }
 0x957   :  { %v1372_v63 = vmul.f32 %v1370_v0, %v1356_v2 }
 0x958   :  { %v3552_v1 = vpop.eup %3551 }
 0x959   :  { %v1371_v57 = vadd.f32 1.0, %v3552_v1 }
 0x95b   :  { %v1373_v3 = vmul.f32 %v1371_v57, %v1357_v56 }
 0x95d   :  { %v1374_v4 = vpack.c.bf16 %v1373_v3, %v1372_v63 }
 0x95f   :  { %3272 = vmatmul.mubr.msk.bf16.vlgmr.msra.gmra.mxu1 %vm1405_vm6, %v1374_v4 }
 0x960   :  { %3291 = vmatprep.mubr.msk.bf16.mxu1 %vm3624_vm1, %v3623_v15 }
 0xa1f   :  { %v1443_v6 = vpop.f32.mrf.mxu1 }
 0xa20   :  { %v1444_v7 = vadd.f32 %v2970_v5, %v1443_v6 }
 0xa21   :  { %v3273_v8 = vpop.f32.mrf.mxu1 }
 0xa22   :  { %v1450_v9 = vadd.f32 %v1444_v7, %v1291_v33 }
 0xa23   :  { %v1446_v11 = vpop.f32.mrf.mxu1 }
 0xa24   :  { %v1447_v12 = vadd.f32 %v2970_v5, %v1446_v11  ;;  %v1452_v13 = vsel %vm65_vm0, %v1450_v9, 0.0 }
 0xa25   :  { %1453 = vadd.xlane.f32.xlu0 %v1452_v13  ;;  %v3274_v14 = vpop.f32.mrf.mxu1 }
 0xa26   :  { %v1451_v31 = vadd.f32 %v1447_v12, %v1292_v35 }
 0xa28   :  { %v1455_v16 = vsel %vm65_vm0, %v1451_v31, 0.0 }
 0xa29   :  { %1456 = vadd.xlane.f32.xlu1 %v1455_v16 }
 0xaae   :  { %v1454_v17 = vpop.xlane.xlu0 %1453 }
 0xaaf   :  { %v1458_v32 = vmul.f32 0.03125, %v1454_v17 }
 0xab1   :  { %v1460_v18 = vsub.f32 %v1450_v9, %v1458_v32 }
 0xab2   :  { %v1457_v19 = vpop.xlane.xlu1 %1456 }
 0xab3   :  { %v1459_v55 = vmul.f32 0.03125, %v1457_v19  ;;  %v1462_v10 = vmul.f32 %v1460_v18, %v1460_v18 }
 0xab5   :  { %v1461_v62 = vsub.f32 %v1451_v31, %v1459_v55  ;;  %v1464_v20 = vsel %vm65_vm0, %v1462_v10, 0.0 }
 0xab6   :  { %1465 = vadd.xlane.f32.xlu0 %v1464_v20 }
 0xab7   :  { %v1463_v21 = vmul.f32 %v1461_v62, %v1461_v62 }
 0xab9   :  { %v1467_v22 = vsel %vm65_vm0, %v1463_v21, 0.0 }
 0xaba   :  { %1468 = vadd.xlane.f32.xlu1 %v1467_v22 }
 0xb3f   :  { %v1466_v25 = vpop.xlane.xlu0 %1465 }
 0xb40   :  { %v1470_v26 = vmul.f32 0.03125, %v1466_v25 }
 0xb42   :  { %v1472_v27 = vadd.f32 1e-12, %v1470_v26 }
 0xb43   :  { %v1469_v29 = vpop.xlane.xlu1 %1468 }
 0xb44   :  { %3553 = vrsqrt.f32 %v1472_v27  ;;  %v1471_v30 = vmul.f32 0.03125, %v1469_v29 }
 0xb46   :  { %v1473_v33 = vadd.f32 1e-12, %v1471_v30 }
 0xb48   :  { %3555 = vrsqrt.f32 %v1473_v33 }
 0xb51   :  { %v3554_v35 = vpop.eup %3553 }
 0xb52   :  { %v1476_v37 = vmul.f32 %v3554_v35, %v1460_v18 }
 0xb54   :  { %v1484_v41 = vmul.f32 %v2976_v38, %v1476_v37 }
 0xb55   :  { %v3556_v39 = vpop.eup %3555 }
 0xb56   :  { %v1477_v40 = vmul.f32 %v3556_v39, %v1461_v62  ;;  %v4066_v45 = vadd.f32 %v2977_v44, %v1484_v41 }
 0xb58   :  { %v1485_v61 = vmul.f32 %v2976_v38, %v1477_v40 }
 0xb5a   :  { %v4068_v46 = vadd.f32 %v2977_v44, %v1485_v61 }
 0xb5c   :  { %v1534_v47 = vpack.c.bf16 %v4068_v46, %v4066_v45 }
 0xb5e   :  { %3280 = vmatmul.mubr.msk.bf16.vlgmr.msra.gmra.mxu0 %vm65_vm0, %v1534_v47 }
 0xb5f   :  { %3285 = vmatprep.mubr.msk.bf16.mxu0 %vm3624_vm1, %v3623_v15 }
 0xc1e   :  { %v1590_v50 = vpop.f32.mrf.mxu0 }
 0xc1f   :  { %v1591_v43 = vadd.f32 %v3006_v42, %v1590_v50 }
 0xc20   :  { %v3281_v51 = vpop.f32.mrf.mxu0 }
 0xc21   :  { %v1617_v54 = vpack.c.bf16 %v1591_v43, %v1591_v43 }
 0xc22   :  { %v1593_v36 = vpop.f32.mrf.mxu0 }
 0xc23   :  { %v1594_v48 = vadd.f32 %v3006_v42, %v1593_v36 }
 0xc24   :  { %v3282_v49 = vpop.f32.mrf.mxu0 }
 0xc25   :  { %v3462_v52 = vpack.i.bf16 %v1594_v48, %v1591_v43  ;;  %v4080_v53 = vpack.c.bf16 %v1594_v48, %v1594_v48 }
 0xc27   :  { %3463 = vrot.lane.b32.xlu1 %v3462_v52, %s3625_s3  ;;  %3458 = vrot.lane.b32.xlu0 %v3462_v52, %s3626_s28 }
 0xc2b   :  { %3468 = vrot.lane.b32.xlu1 %v3462_v52, %s3627_s29  ;;  %1675 = vrot.lane.b32.xlu0 %v4080_v53, %s3628_s30 }
 0xc2f   :  { %1626 = vrot.lane.b32.xlu1 %v1617_v54, %s3628_s30 }
 0xc99   :  { %v3464_v58 = vpop.permute.xlu1 %3463  ;;  %v3459_v59 = vpop.permute.xlu0 %3458 }
 0xc9a   :  { %v3461_v60 = vunpack.i.h.bf16 %v3459_v59  ;;  %v3460_v0 = vunpack.i.l.bf16 %v3459_v59  ;;  %v3466_v1 = vunpack.i.h.bf16 %v3464_v58  ;;  %v3465_v2 = vunpack.i.l.bf16 %v3464_v58 }
 0xc9c   :  { %v4086_v56 = vpack.c.bf16 %v3461_v60, %v3461_v60  ;;  %v4088_v57 = vpack.c.bf16 %v3460_v0, %v3460_v0  ;;  %v4095_v5 = vpack.c.bf16 %v3466_v1, %v3466_v1  ;;  %v4097_v6 = vpack.c.bf16 %v3465_v2, %v3465_v2 }
 0xc9d   :  { %v3469_v63 = vpop.permute.xlu1 %3468  ;;  %v1676_v3 = vpop.permute.xlu0 %1675 }
 0xc9e   :  { %v1681_v4 = vsel %vm257_vm2, %v1676_v3, 0  ;;  %1724 = vrot.lane.b32.xlu1 %v4088_v57, %s3628_s30  ;;  %1773 = vrot.lane.b32.xlu0 %v4086_v56, %s3628_s30  ;;  %v3471_v7 = vunpack.i.h.bf16 %v3469_v63  ;;  %v3470_v8 = vunpack.i.l.bf16 %v3469_v63 }
 0xc9f   :  { %3290 = vmatpush3.bf16.xpose.msra.mxu1 %v1681_v4 }
 0xca0   :  { %3301 = vmatprep.subr.bf16.mxu1 %v3623_v15  ;;  %v4105_v12 = vpack.c.bf16 %v3471_v7, %v3471_v7  ;;  %v4107_v13 = vpack.c.bf16 %v3470_v8, %v3470_v8 }
 0xca1   :  { %v1627_v9 = vpop.permute.xlu1 %1626 }
 0xca2   :  { %v1632_v11 = vsel %vm257_vm2, %v1627_v9, 0  ;;  %1822 = vrot.lane.b32.xlu1 %v4097_v6, %s3628_s30  ;;  %1871 = vrot.lane.b32.xlu0 %v4095_v5, %s3628_s30 }
 0xca3   :  { %3284 = vmatpush3.bf16.xpose.msra.mxu0 %v1632_v11 }
 0xca4   :  { %3295 = vmatprep.subr.bf16.mxu0 %v3623_v15 }
 0xca6   :  { %1920 = vrot.lane.b32.xlu1 %v4107_v13, %s3628_s30  ;;  %1969 = vrot.lane.b32.xlu0 %v4105_v12, %s3628_s30 }
 0xca7   :  { %3292 = vmatmul.mubr.msk.bf16.vlgmr.msra.gmra.mxu1 %vm257_vm2, %v4080_v53 }
 0xca8   :  { %3303 = vmatprep.mubr.msk.bf16.mxu1 %vm3624_vm1, %v3623_v15 }
 0xcaa   :  { %3286 = vmatmul.mubr.msk.bf16.vlgmr.msra.gmra.mxu0 %vm257_vm2, %v1617_v54  ;;  %2129 = vrot.lane.b32.xlu1 %v1617_v54, %s3629_s0 }
 0xcab   :  { %3297 = vmatprep.mubr.msk.bf16.mxu0 %vm3624_vm1, %v3623_v15 }
 0xd10   :  { %v1725_v14 = vpop.permute.xlu1 %1724  ;;  %v1774_v31 = vpop.permute.xlu0 %1773 }
 0xd11   :  { %v1730_v16 = vsel %vm257_vm2, %v1725_v14, 0  ;;  %v1779_v17 = vsel %vm257_vm2, %v1774_v31, 0 }
 0xd12   :  { %3296 = vmatpush3.bf16.xpose.msra.mxu0 %v1730_v16  ;;  %3302 = vmatpush3.bf16.xpose.msra.mxu1 %v1779_v17 }
 0xd13   :  { %3307 = vmatprep.subr.bf16.mxu0 %v3623_v15  ;;  %3313 = vmatprep.subr.bf16.mxu1 %v3623_v15 }
 0xd14   :  { %v1823_v32 = vpop.permute.xlu1 %1822  ;;  %v1872_v18 = vpop.permute.xlu0 %1871 }
 0xd15   :  { %v1828_v19 = vsel %vm257_vm2, %v1823_v32, 0  ;;  %v1877_v55 = vsel %vm257_vm2, %v1872_v18, 0 }
 0xd18   :  { %v1921_v10 = vpop.permute.xlu1 %1920  ;;  %v1970_v62 = vpop.permute.xlu0 %1969 }
 0xd19   :  { %3298 = vmatmul.mubr.msk.bf16.vlgmr.msra.gmra.mxu0 %vm257_vm2, %v4088_v57  ;;  %3304 = vmatmul.mubr.msk.bf16.vlgmr.msra.gmra.mxu1 %vm257_vm2, %v4086_v56  ;;  %v1926_v20 = vsel %vm257_vm2, %v1921_v10, 0  ;;  %v1975_v21 = vsel %vm257_vm2, %v1970_v62, 0 }
 0xd1a   :  { %3308 = vmatpush3.bf16.xpose.msra.mxu0 %v1828_v19  ;;  %3314 = vmatpush3.bf16.xpose.msra.mxu1 %v1877_v55 }
 0xd1b   :  { %3309 = vmatprep.mubr.msk.bf16.mxu0 %vm3624_vm1, %v3623_v15  ;;  %3315 = vmatprep.mubr.msk.bf16.mxu1 %vm3624_vm1, %v3623_v15 }
 0xd1c   :  { %3319 = vmatprep.subr.bf16.mxu0 %v3623_v15  ;;  %3325 = vmatprep.subr.bf16.mxu1 %v3623_v15  ;;  %v2130_v22 = vpop.permute.xlu1 %2129 }
 0xd1d   :  { %v2135_v23 = vsel %vm774_vm3, %v2130_v22, 0 }
 0xd21   :  { %3310 = vmatmul.mubr.msk.bf16.vlgmr.msra.gmra.mxu0 %vm257_vm2, %v4097_v6  ;;  %3316 = vmatmul.mubr.msk.bf16.vlgmr.msra.gmra.mxu1 %vm257_vm2, %v4095_v5 }
 0xd22   :  { %3320 = vmatpush3.bf16.xpose.msra.mxu0 %v1926_v20  ;;  %3326 = vmatpush3.bf16.xpose.msra.mxu1 %v1975_v21 }
 0xd23   :  { %3321 = vmatprep.mubr.msk.bf16.mxu0 %vm3624_vm1, %v3623_v15  ;;  %3327 = vmatprep.mubr.msk.bf16.mxu1 %vm3624_vm1, %v3623_v15 }
 0xd24   :  { %3331 = vmatprep.subr.bf16.mxu0 %v3623_v15  ;;  %3337 = vmatprep.subr.bf16.mxu1 %v3623_v15 }
 0xd29   :  { %3322 = vmatmul.mubr.msk.bf16.vlgmr.msra.gmra.mxu0 %vm257_vm2, %v4107_v13  ;;  %3328 = vmatmul.mubr.msk.bf16.vlgmr.msra.gmra.mxu1 %vm257_vm2, %v4105_v12 }
 0xd2a   :  { %3332 = vmatpush3.bf16.msra.mxu0 %v2135_v23  ;;  %3339 = vmatprep.mubr.msk.bf16.mxu1 %vm3624_vm1, %v3623_v15 }
 0xd2b   :  { %3333 = vmatprep.mubr.msk.bf16.mxu0 %vm3624_vm1, %v3623_v15  ;;  %3343 = vmatprep.subr.bf16.mxu0 %v3623_v15 }
 0xd67   :  { %v1717_v24 = vpop.f32.mrf.mxu1 }
 0xd68   :  { %v2018_v25 = vmul.f32 0.35355338, %v1717_v24 }
 0xd69   :  { %v3293_v26 = vpop.f32.mrf.mxu1 }
 0xd6a   :  { %v1668_v27 = vpop.f32.mrf.mxu0  ;;  %v4161_v29 = vadd.f32 %v2018_v25, %v3857_v28 }
 0xd6b   :  { %v2017_v30 = vmul.f32 0.35355338, %v1668_v27  ;;  %v1720_v33 = vpop.f32.mrf.mxu1 }
 0xd6c   :  { %v2036_v35 = vsel %vm257_vm2, %v4161_v29, -inf  ;;  %v3287_v37 = vpop.f32.mrf.mxu0 }
 0xd6d   :  { %2037 = vmax.xlane.f32.xlu0 %v2036_v35  ;;  %v3294_v38 = vpop.f32.mrf.mxu1  ;;  %v2025_v39 = vadd.f32 %v2017_v30, %v3859_v34 }
 0xd6e   :  { %v1671_v40 = vpop.f32.mrf.mxu0 }
 0xd6f   :  { %v2033_v41 = vsel %vm257_vm2, %v2025_v39, -inf }
 0xd70   :  { %2034 = vmax.xlane.f32.xlu1 %v2033_v41  ;;  %v3288_v44 = vpop.f32.mrf.mxu0 }
 0xdd9   :  { %v1766_v61 = vpop.f32.mrf.mxu0  ;;  %v1815_v47 = vpop.f32.mrf.mxu1 }
 0xdda   :  { %v2019_v50 = vmul.f32 0.35355338, %v1766_v61  ;;  %v2020_v42 = vmul.f32 0.35355338, %v1815_v47 }
 0xddb   :  { %v3299_v51 = vpop.f32.mrf.mxu0  ;;  %v3305_v36 = vpop.f32.mrf.mxu1 }
 0xddc   :  { %v2027_v43 = vadd.f32 %v2019_v50, %v3859_v34  ;;  %v2028_v54 = vadd.f32 %v2020_v42, %v3857_v28 }
 0xddd   :  { %v1769_v48 = vpop.f32.mrf.mxu0  ;;  %v1818_v49 = vpop.f32.mrf.mxu1 }
 0xdde   :  { %v2039_v52 = vsel %vm257_vm2, %v2027_v43, -inf  ;;  %v2042_v63 = vsel %vm257_vm2, %v2028_v54, -inf }
 0xddf   :  { %v3306_v58 = vpop.f32.mrf.mxu1  ;;  %2040 = vmax.xlane.f32.xlu0 %v2039_v52  ;;  %v3300_v59 = vpop.f32.mrf.mxu0 }
 0xde1   :  { %v1864_v60 = vpop.f32.mrf.mxu0  ;;  %v1913_v0 = vpop.f32.mrf.mxu1 }
 0xde2   :  { %v2021_v1 = vmul.f32 0.35355338, %v1864_v60  ;;  %v2022_v2 = vmul.f32 0.35355338, %v1913_v0 }
 0xde3   :  { %v3317_v3 = vpop.f32.mrf.mxu1  ;;  %2043 = vmax.xlane.f32.xlu0 %v2042_v63  ;;  %v3311_v4 = vpop.f32.mrf.mxu0 }
 0xde4   :  { %v4172_v7 = vadd.f32 %v2022_v2, %v3857_v28  ;;  %v2029_v8 = vadd.f32 %v2021_v1, %v3859_v34 }
 0xde5   :  { %v1867_v9 = vpop.f32.mrf.mxu0  ;;  %v1916_v11 = vpop.f32.mrf.mxu1 }
 0xde6   :  { %v2048_v14 = vsel %vm257_vm2, %v4172_v7, -inf  ;;  %v2045_v31 = vsel %vm257_vm2, %v2029_v8, -inf }
 0xde7   :  { %v3318_v16 = vpop.f32.mrf.mxu1  ;;  %2049 = vmax.xlane.f32.xlu0 %v2048_v14  ;;  %2046 = vmax.xlane.f32.xlu1 %v2045_v31  ;;  %v3312_v17 = vpop.f32.mrf.mxu0 }
 0xde9   :  { %v1962_v32 = vpop.f32.mrf.mxu0  ;;  %v2011_v18 = vpop.f32.mrf.mxu1 }
 0xdea   :  { %v2023_v19 = vmul.f32 0.35355338, %v1962_v32  ;;  %v2024_v55 = vmul.f32 0.35355338, %v2011_v18 }
 0xdeb   :  { %v3323_v10 = vpop.f32.mrf.mxu0  ;;  %v3329_v62 = vpop.f32.mrf.mxu1 }
 0xdec   :  { %v4179_v20 = vadd.f32 %v2024_v55, %v3857_v28  ;;  %v2031_v21 = vadd.f32 %v2023_v19, %v3859_v34 }
 0xded   :  { %v1965_v22 = vpop.f32.mrf.mxu0  ;;  %v2014_v23 = vpop.f32.mrf.mxu1 }
 0xdee   :  { %v2054_v24 = vsel %vm257_vm2, %v4179_v20, -inf  ;;  %v2051_v25 = vsel %vm257_vm2, %v2031_v21, -inf }
 0xdef   :  { %v3330_v26 = vpop.f32.mrf.mxu1  ;;  %2055 = vmax.xlane.f32.xlu0 %v2054_v24  ;;  %2052 = vmax.xlane.f32.xlu1 %v2051_v25  ;;  %v3324_v27 = vpop.f32.mrf.mxu0 }
 0xdf6   :  { %v2038_v28 = vpop.xlane.xlu0 %2037 }
 0xdf7   :  { %v2058_v34 = vsub.f32 %v4161_v29, %v2038_v28 }
 0xdf9   :  { %v2035_v30 = vpop.xlane.xlu1 %2034  ;;  %v2067_v33 = vmul.f32 1.442695, %v2058_v34 }
 0xdfa   :  { %v2057_v35 = vsub.f32 %v2025_v39, %v2035_v30 }
 0xdfb   :  { %3557 = vpow2.f32 %v2067_v33 }
 0xdfc   :  { %v2065_v37 = vmul.f32 1.442695, %v2057_v35 }
 0xdfe   :  { %3559 = vpow2.f32 %v2065_v37 }
 0xe00   :  { %2225 = vrot.lane.b32.xlu1 %v4088_v57, %s3629_s0 }
 0xe04   :  { %2273 = vrot.lane.b32.xlu1 %v4086_v56, %s3629_s0 }
 0xe05   :  { %2177 = vrot.lane.b32.xlu0 %v4080_v53, %s3629_s0 }
 0xe08   :  { %v3558_v38 = vpop.eup %3557 }
 0xe09   :  { %v2084_v40 = vsel %vm257_vm2, %v3558_v38, 0.0 }
 0xe0b   :  { %v4193_v41 = vpop.eup %3559 }
 0xe0c   :  { %v2081_v56 = vsel %vm257_vm2, %v4193_v41, 0.0 }
 0xe24   :  { %2085 = vadd.xlane.f32.xlu0 %v2084_v40 }
 0xe28   :  { %2082 = vadd.xlane.f32.xlu1 %v2081_v56 }
 0xe39   :  { %2321 = vrot.lane.b32.xlu1 %v4097_v6, %s3629_s0 }
 0xe68   :  { %v2041_v53 = vpop.xlane.xlu0 %2040 }
 0xe69   :  { %v2059_v57 = vsub.f32 %v2027_v43, %v2041_v53 }
 0xe6b   :  { %v2069_v29 = vmul.f32 1.442695, %v2059_v57 }
 0xe6c   :  { %v2044_v39 = vpop.xlane.xlu0 %2043 }
 0xe6d   :  { %3561 = vpow2.f32 %v2069_v29  ;;  %v2060_v44 = vsub.f32 %v2028_v54, %v2044_v39 }
 0xe6f   :  { %v2071_v61 = vmul.f32 1.442695, %v2060_v44 }
 0xe70   :  { %v2047_v47 = vpop.xlane.xlu1 %2046  ;;  %v2050_v51 = vpop.xlane.xlu0 %2049 }
 0xe71   :  { %3563 = vpow2.f32 %v2071_v61  ;;  %v2061_v50 = vsub.f32 %v2029_v8, %v2047_v47  ;;  %v2062_v3 = vsub.f32 %v4172_v7, %v2050_v51 }
 0xe73   :  { %v2073_v42 = vmul.f32 1.442695, %v2061_v50  ;;  %v2075_v4 = vmul.f32 1.442695, %v2062_v3 }
 0xe75   :  { %3565 = vpow2.f32 %v2073_v42 }
 0xe78   :  { %v2056_v36 = vpop.xlane.xlu0 %2055  ;;  %v2053_v48 = vpop.xlane.xlu1 %2052 }
 0xe79   :  { %v2063_v49 = vsub.f32 %v2031_v21, %v2053_v48  ;;  %v2064_v8 = vsub.f32 %v4179_v20, %v2056_v36 }
 0xe7a   :  { %v4199_v52 = vpop.eup %3561 }
 0xe7b   :  { %v2077_v58 = vmul.f32 1.442695, %v2063_v49  ;;  %v2087_v6 = vsel %vm257_vm2, %v4199_v52, 0.0  ;;  %v2079_v9 = vmul.f32 1.442695, %v2064_v8 }
 0xe7c   :  { %v2178_v43 = vpop.permute.xlu0 %2177  ;;  %2088 = vadd.xlane.f32.xlu1 %v2087_v6  ;;  %v2226_v11 = vpop.permute.xlu1 %2225 }
 0xe7d   :  { %v2183_v54 = vsel %vm774_vm3, %v2178_v43, 0  ;;  %3567 = vpow2.f32 %v2077_v58  ;;  %v2231_v21 = vsel %vm774_vm3, %v2226_v11, 0 }
 0xe7e   :  { %v4204_v59 = vpop.eup %3563  ;;  %3338 = vmatpush3.bf16.msra.mxu1 %v2183_v54  ;;  %3569 = vpow2.f32 %v2075_v4 }
 0xe7f   :  { %v2090_v60 = vsel %vm257_vm2, %v4204_v59, 0.0  ;;  %3349 = vmatprep.subr.bf16.mxu1 %v3623_v15  ;;  %3571 = vpow2.f32 %v2079_v9 }
 0xe80   :  { %2091 = vadd.xlane.f32.xlu0 %v2090_v60  ;;  %v2274_v14 = vpop.permute.xlu1 %2273 }
 0xe81   :  { %v2279_v10 = vsel %vm774_vm3, %v2274_v14, 0 }
 0xe82   :  { %v4209_v0 = vpop.eup %3565 }
 0xe83   :  { %v2093_v1 = vsel %vm257_vm2, %v4209_v0, 0.0 }
 0xe84   :  { %2094 = vadd.xlane.f32.xlu1 %v2093_v1 }
 0xe8a   :  { %v4213_v2 = vpop.eup %3567 }
 0xe8b   :  { %v2099_v63 = vsel %vm257_vm2, %v4213_v2, 0.0  ;;  %v4223_v16 = vpop.eup %3569 }
 0xe8c   :  { %2100 = vadd.xlane.f32.xlu1 %v2099_v63  ;;  %v4227_v7 = vpop.eup %3571 }
 0xe96   :  { %2369 = vrot.lane.b32.xlu0 %v4095_v5, %s3629_s0  ;;  %v2096_v5 = vsel %vm257_vm2, %v4223_v16, 0.0 }
 0xe9d   :  { %2417 = vrot.lane.b32.xlu1 %v4107_v13, %s3629_s0  ;;  %v2102_v13 = vsel %vm257_vm2, %v4227_v7, 0.0 }
 0xead   :  { %v2086_v31 = vpop.xlane.xlu0 %2085 }
 0xeae   :  { %3573 = vrcp.f32 %v2086_v31 }
 0xeb1   :  { %v2083_v17 = vpop.xlane.xlu1 %2082 }
 0xeb2   :  { %3575 = vrcp.f32 %v2083_v17 }
 0xeb5   :  { %2097 = vadd.xlane.f32.xlu0 %v2096_v5  ;;  %v2322_v22 = vpop.permute.xlu1 %2321 }
 0xeb6   :  { %v2327_v33 = vsel %vm774_vm3, %v2322_v22, 0 }
 0xeb9   :  { %2103 = vadd.xlane.f32.xlu0 %v2102_v13 }
 0xebb   :  { %v3574_v32 = vpop.eup %3573 }
 0xebc   :  { %v2114_v18 = vmul.f32 %v3574_v32, %v3558_v38 }
 0xebe   :  { %v2122_v19 = vpack.c.bf16 %v2114_v18, %v2114_v18 }
 0xebf   :  { %v3576_v55 = vpop.eup %3575 }
 0xec0   :  { %3340 = vmatmul.mubr.msk.bf16.vlgmr.msra.gmra.mxu1 %vm257_vm2, %v2122_v19  ;;  %v2113_v62 = vmul.f32 %v3576_v55, %v4193_v41 }
 0xec1   :  { %3350 = vmatpush3.bf16.msra.mxu1 %v2279_v10  ;;  %3351 = vmatprep.mubr.msk.bf16.mxu1 %vm3624_vm1, %v3623_v15  ;;  %v3499_v10 = vld [vmem:[%s4374_s6 + $0x18] sm:$0xff]  }
 0xec2   :  { %v2121_v20 = vpack.c.bf16 %v2113_v62, %v2113_v62  ;;  %3361 = vmatprep.subr.bf16.mxu1 %v3623_v15 }
 0xec4   :  { %3334 = vmatmul.mubr.msk.bf16.vlgmr.msra.gmra.mxu0 %vm257_vm2, %v2121_v20  ;;  %v3500_v20 = vld [vmem:[%s4374_s6 + $0x10] sm:$0xff]  }
 0xec5   :  { %3344 = vmatpush3.bf16.msra.mxu0 %v2231_v21  ;;  %3345 = vmatprep.mubr.msk.bf16.mxu0 %vm3624_vm1, %v3623_v15 }
 0xec6   :  { %3355 = vmatprep.subr.bf16.mxu0 %v3623_v15 }
 0xecf   :  { %2465 = vrot.lane.b32.xlu0 %v4105_v12, %s3629_s0 }
 0xf05   :  { %v2089_v23 = vpop.xlane.xlu1 %2088 }
 0xf06   :  { %3577 = vrcp.f32 %v2089_v23 }
 0xf09   :  { %v2092_v24 = vpop.xlane.xlu0 %2091 }
 0xf0a   :  { %3579 = vrcp.f32 %v2092_v24 }
 0xf0d   :  { %v2095_v25 = vpop.xlane.xlu1 %2094  ;;  %v2370_v35 = vpop.permute.xlu0 %2369 }
 0xf0e   :  { %3581 = vrcp.f32 %v2095_v25  ;;  %v2375_v40 = vsel %vm774_vm3, %v2370_v35, 0 }
 0xf13   :  { %v3578_v26 = vpop.eup %3577 }
 0xf14   :  { %v2115_v27 = vmul.f32 %v3578_v26, %v4199_v52 }
 0xf15   :  { %v2101_v28 = vpop.xlane.xlu1 %2100 }
 0xf16   :  { %v2123_v34 = vpack.c.bf16 %v2115_v27, %v2115_v27  ;;  %3583 = vrcp.f32 %v2101_v28 }
 0xf17   :  { %v3580_v30 = vpop.eup %3579 }
 0xf18   :  { %3346 = vmatmul.mubr.msk.bf16.vlgmr.msra.gmra.mxu0 %vm257_vm2, %v2123_v34  ;;  %v2116_v12 = vmul.f32 %v3580_v30, %v4204_v59 }
 0xf19   :  { %3356 = vmatpush3.bf16.msra.mxu0 %v2327_v33  ;;  %3357 = vmatprep.mubr.msk.bf16.mxu0 %vm3624_vm1, %v3623_v15  ;;  %v2418_v56 = vpop.permute.xlu1 %2417 }
 0xf1a   :  { %v2124_v37 = vpack.c.bf16 %v2116_v12, %v2116_v12  ;;  %3367 = vmatprep.subr.bf16.mxu0 %v3623_v15  ;;  %v2423_v57 = vsel %vm774_vm3, %v2418_v56, 0 }
 0xf1b   :  { %v3582_v38 = vpop.eup %3581 }
 0xf1c   :  { %3352 = vmatmul.mubr.msk.bf16.vlgmr.msra.gmra.mxu1 %vm257_vm2, %v2124_v37  ;;  %v2117_v41 = vmul.f32 %v3582_v38, %v4209_v0 }
 0xf1d   :  { %3362 = vmatpush3.bf16.msra.mxu1 %v2375_v40  ;;  %3363 = vmatprep.mubr.msk.bf16.mxu1 %vm3624_vm1, %v3623_v15 }
 0xf1e   :  { %3373 = vmatprep.subr.bf16.mxu1 %v3623_v15  ;;  %v2125_v53 = vpack.c.bf16 %v2117_v41, %v2117_v41 }
 0xf20   :  { %3358 = vmatmul.mubr.msk.bf16.vlgmr.msra.gmra.mxu0 %vm257_vm2, %v2125_v53 }
 0xf21   :  { %3368 = vmatpush3.bf16.msra.mxu0 %v2423_v57  ;;  %3369 = vmatprep.mubr.msk.bf16.mxu0 %vm3624_vm1, %v3623_v15 }
 0xf22   :  { %3379 = vmatprep.subr.bf16.mxu0 %v3623_v15 }
 0xf23   :  { %v3584_v29 = vpop.eup %3583 }
 0xf24   :  { %v2119_v39 = vmul.f32 %v3584_v29, %v4213_v2 }
 0xf26   :  { %v2127_v44 = vpack.c.bf16 %v2119_v39, %v2119_v39 }
 0xf28   :  { %3370 = vmatmul.mubr.msk.bf16.vlgmr.msra.gmra.mxu0 %vm257_vm2, %v2127_v44 }
 0xf29   :  { %3383 = vmatprep.mubr.msk.bf16.mxu0 %vm3624_vm1, %v3623_v15  ;;  %3380 = vmatpush3.bf16.msra.mxu0 %v3499_v10  ;;  %v3031_v10 = vld [vmem:[%s4377_s9 + $0x1] ss:$0 sm:$0xff] }
 0xf2a   :  { %3381 = vmatprep.subr.bf16.mxu0 %v3623_v15 }
 0xf2d   :  { %3382 = vmatpush3.bf16.msra.mxu0 %v3500_v20 }
 0xf2e   :  { %3395 = vmatprep.subr.bf16.mxu0 %v3623_v15 }
 0xf3e   :  { %v2098_v61 = vpop.xlane.xlu0 %2097 }
 0xf3f   :  { %3585 = vrcp.f32 %v2098_v61 }
 0xf42   :  { %v2104_v47 = vpop.xlane.xlu0 %2103 }
 0xf43   :  { %3587 = vrcp.f32 %v2104_v47 }
 0xf46   :  { %v2466_v51 = vpop.permute.xlu0 %2465 }
 0xf47   :  { %v2471_v49 = vsel %vm774_vm3, %v2466_v51, 0 }
 0xf4c   :  { %v3586_v50 = vpop.eup %3585 }
 0xf4d   :  { %v2118_v42 = vmul.f32 %v3586_v50, %v4223_v16  ;;  %v3026_v50 = vld [vmem:[%s4375_s7 + $0x1] ss:$0 sm:$0xff] }
 0xf4f   :  { %v2126_v36 = vpack.c.bf16 %v2118_v42, %v2118_v42 }
 0xf50   :  { %v3588_v48 = vpop.eup %3587 }
 0xf51   :  { %3364 = vmatmul.mubr.msk.bf16.vlgmr.msra.gmra.mxu1 %vm257_vm2, %v2126_v36  ;;  %v2120_v52 = vmul.f32 %v3588_v48, %v4227_v7 }
 0xf52   :  { %3374 = vmatpush3.bf16.msra.mxu1 %v2471_v49  ;;  %3375 = vmatprep.mubr.msk.bf16.mxu1 %vm3624_vm1, %v3623_v15 }
 0xf53   :  { %3387 = vmatprep.subr.bf16.mxu1 %v3623_v15  ;;  %v2128_v58 = vpack.c.bf16 %v2120_v52, %v2120_v52 }
 0xf59   :  { %3376 = vmatmul.mubr.msk.bf16.vlgmr.msra.gmra.mxu1 %vm257_vm2, %v2128_v58 }
 0xf5a   :  { %3391 = vmatprep.mubr.msk.bf16.mxu1 %vm3624_vm1, %v3623_v15 }
 0xf80   :  { %v2219_v6 = vpop.f32.mrf.mxu1 }
 0xf82   :  { %v3341_v43 = vpop.f32.mrf.mxu1 }
 0xf84   :  { %v2171_v54 = vpop.f32.mrf.mxu0  ;;  %v2222_v59 = vpop.f32.mrf.mxu1 }
 0xf86   :  { %v3335_v60 = vpop.f32.mrf.mxu0  ;;  %v3342_v0 = vpop.f32.mrf.mxu1 }
 0xf88   :  { %v2174_v1 = vpop.f32.mrf.mxu0 }
 0xf8a   :  { %v3336_v2 = vpop.f32.mrf.mxu0 }
 0xfd8   :  { %v2267_v63 = vpop.f32.mrf.mxu0 }
 0xfda   :  { %v3347_v3 = vpop.f32.mrf.mxu0 }
 0xfdc   :  { %v2270_v4 = vpop.f32.mrf.mxu0  ;;  %v2315_v8 = vpop.f32.mrf.mxu1 }
 0xfdd   :  { %v3472_v9 = vpack.i.bf16 %v2315_v8, %v2267_v63 }
 0xfde   :  { %v3348_v11 = vpop.f32.mrf.mxu0  ;;  %v3353_v14 = vpop.f32.mrf.mxu1 }
 0xfdf   :  { %3473 = vrot.lane.b32.xlu1 %v3472_v9, %s3631_s21  ;;  %v3502_v9 = vld [vmem:[%s4378_s10 + $0x10] sm:$0xff]  }
 0xfe0   :  { %v2318_v31 = vpop.f32.mrf.mxu1  ;;  %v2363_v16 = vpop.f32.mrf.mxu0 }
 0xfe2   :  { %v3354_v17 = vpop.f32.mrf.mxu1  ;;  %v3359_v5 = vpop.f32.mrf.mxu0 }
 0xfe4   :  { %v2366_v7 = vpop.f32.mrf.mxu0 }
 0xfe6   :  { %v3360_v13 = vpop.f32.mrf.mxu0 }
 0xfe8   :  { %v2459_v32 = vpop.f32.mrf.mxu0 }
 0xfea   :  { %v3371_v18 = vpop.f32.mrf.mxu0 }
 0xfec   :  { %v2462_v19 = vpop.f32.mrf.mxu0 }
 0xfee   :  { %v3372_v55 = vpop.f32.mrf.mxu0 }
0x1011   :  { %v2411_v62 = vpop.f32.mrf.mxu1 }
0x1012   :  { %v3477_v21 = vpack.i.bf16 %v2411_v62, %v2363_v16 }
0x1013   :  { %v3365_v22 = vpop.f32.mrf.mxu1 }
0x1014   :  { %3478 = vrot.lane.b32.xlu0 %v3477_v21, %s3632_s25 }
0x1015   :  { %v2414_v23 = vpop.f32.mrf.mxu1 }
0x1016   :  { %v3503_v23 = vld [vmem:[%s4380_s12 + $0x38] sm:$0xff]  }
0x1017   :  { %v3366_v24 = vpop.f32.mrf.mxu1 }
0x1018   :  { %v3504_v24 = vld [vmem:[%s4380_s12 + $0x30] sm:$0xff]  }
0x1019   :  { %v2507_v25 = vpop.f32.mrf.mxu1 }
0x101a   :  { %v3482_v26 = vpack.i.bf16 %v2507_v25, %v2459_v32  ;;  %v3030_v32 = vld [vmem:[%s4376_s8 + $0x1] ss:$0 sm:$0xff]  ;;  %v3505_v25 = vld [vmem:[%s4380_s12 + $0x28] sm:$0xff]  }
0x101b   :  { %v3377_v27 = vpop.f32.mrf.mxu1 }
0x101c   :  { %3483 = vrot.lane.b32.xlu1 %v3482_v26, %s3633_s26  ;;  %v3506_v26 = vld [vmem:[%s4380_s12 + $0x20] sm:$0xff]  }
0x101d   :  { %v2510_v28 = vpop.f32.mrf.mxu1  ;;  %v3032_v27 = vld [vmem:[%s4379_s11 + $0x1] ss:$0 sm:$0xff] }
0x101f   :  { %v3378_v34 = vpop.f32.mrf.mxu1 }
0x1051   :  { %v3474_v30 = vpop.permute.xlu1 %3473 }
0x1052   :  { %v3476_v12 = vunpack.i.h.bf16 %v3474_v30  ;;  %v3475_v35 = vunpack.i.l.bf16 %v3474_v30 }
0x1054   :  { %v2538_v41 = vsel %vm257_vm2, %v2219_v6, %v3476_v12  ;;  %v2537_v56 = vsel %vm257_vm2, %v2171_v54, %v3475_v35 }
0x1086   :  { %v3479_v33 = vpop.permute.xlu0 %3478 }
0x1087   :  { %v3481_v37 = vunpack.i.h.bf16 %v3479_v33  ;;  %v3480_v38 = vunpack.i.l.bf16 %v3479_v33 }
0x1089   :  { %v2540_v29 = vsel %vm1180_vm4, %v2538_v41, %v3481_v37  ;;  %v2539_v39 = vsel %vm1180_vm4, %v2537_v56, %v3480_v38 }
0x108e   :  { %v3484_v40 = vpop.permute.xlu1 %3483 }
0x108f   :  { %v3486_v53 = vunpack.i.h.bf16 %v3484_v40  ;;  %v3485_v57 = vunpack.i.l.bf16 %v3484_v40 }
0x1091   :  { %v2542_v44 = vsel %vm1183_vm5, %v2540_v29, %v3486_v53  ;;  %v2541_v61 = vsel %vm1183_vm5, %v2539_v39, %v3485_v57 }
0x1092   :  { %v2543_v47 = vpack.c.bf16 %v2542_v44, %v2541_v61 }
0x1094   :  { %3384 = vmatmul.mubr.msk.bf16.vlgmr.msra.gmra.mxu0 %vm65_vm0, %v2543_v47 }
0x1095   :  { %3403 = vmatprep.mubr.msk.bf16.mxu0 %vm3624_vm1, %v3623_v15  ;;  %3396 = vmatpush3.bf16.msra.mxu0 %v3503_v23 }
0x1096   :  { %3397 = vmatprep.subr.bf16.mxu0 %v3623_v15 }
0x1099   :  { %3398 = vmatpush3.bf16.msra.mxu0 %v3504_v24 }
0x109a   :  { %3399 = vmatprep.subr.bf16.mxu0 %v3623_v15 }
0x109d   :  { %3400 = vmatpush3.bf16.msra.mxu0 %v3505_v25 }
0x109e   :  { %3401 = vmatprep.subr.bf16.mxu0 %v3623_v15 }
0x10a1   :  { %3402 = vmatpush3.bf16.msra.mxu0 %v3506_v26 }
0x1154   :  { %v2599_v42 = vpop.f32.mrf.mxu0 }
0x1155   :  { %v2600_v51 = vadd.f32 %v3026_v50, %v2599_v42 }
0x1156   :  { %v3385_v36 = vpop.f32.mrf.mxu0 }
0x1157   :  { %v2606_v48 = vadd.f32 %v2600_v51, %v4066_v45 }
0x1158   :  { %v2602_v49 = vpop.f32.mrf.mxu0 }
0x1159   :  { %v2603_v52 = vadd.f32 %v3026_v50, %v2602_v49  ;;  %v2608_v58 = vsel %vm65_vm0, %v2606_v48, 0.0 }
0x115a   :  { %2609 = vadd.xlane.f32.xlu0 %v2608_v58  ;;  %v3386_v6 = vpop.f32.mrf.mxu0  ;;  %v3036_v58 = vld [vmem:[%s4381_s13 + $0x1] ss:$0 sm:$0xff] }
0x115b   :  { %v2607_v43 = vadd.f32 %v2603_v52, %v4068_v46  ;;  %v3501_v46 = vld [vmem:[%s4378_s10 + $0x18] sm:$0xff]  }
0x115c   :  { %3388 = vmatpush3.bf16.msra.mxu1 %v3501_v46 }
0x115d   :  { %v2611_v54 = vsel %vm65_vm0, %v2607_v43, 0.0  ;;  %3389 = vmatprep.subr.bf16.mxu1 %v3623_v15 }
0x115e   :  { %2612 = vadd.xlane.f32.xlu1 %v2611_v54 }
0x1160   :  { %3390 = vmatpush3.bf16.msra.mxu1 %v3502_v9 }
0x1161   :  { %3407 = vmatprep.subr.bf16.mxu1 %v3623_v15 }
0x11e3   :  { %v2610_v59 = vpop.xlane.xlu0 %2609 }
0x11e4   :  { %v2614_v60 = vmul.f32 0.03125, %v2610_v59 }
0x11e6   :  { %v2616_v0 = vsub.f32 %v2606_v48, %v2614_v60 }
0x11e7   :  { %v2613_v1 = vpop.xlane.xlu1 %2612 }
0x11e8   :  { %v2615_v2 = vmul.f32 0.03125, %v2613_v1  ;;  %v2618_v63 = vmul.f32 %v2616_v0, %v2616_v0 }
0x11ea   :  { %v2617_v3 = vsub.f32 %v2607_v43, %v2615_v2  ;;  %v2620_v45 = vsel %vm65_vm0, %v2618_v63, 0.0 }
0x11eb   :  { %2621 = vadd.xlane.f32.xlu0 %v2620_v45 }
0x11ec   :  { %v2619_v4 = vmul.f32 %v2617_v3, %v2617_v3 }
0x11ee   :  { %v2623_v8 = vsel %vm65_vm0, %v2619_v4, 0.0 }
0x11ef   :  { %2624 = vadd.xlane.f32.xlu0 %v2623_v8 }
0x1274   :  { %v2622_v11 = vpop.xlane.xlu0 %2621 }
0x1275   :  { %v2626_v14 = vmul.f32 0.03125, %v2622_v11 }
0x1277   :  { %v2628_v31 = vadd.f32 1e-12, %v2626_v14 }
0x1278   :  { %v2625_v16 = vpop.xlane.xlu0 %2624 }
0x1279   :  { %3589 = vrsqrt.f32 %v2628_v31  ;;  %v2627_v17 = vmul.f32 0.03125, %v2625_v16 }
0x127b   :  { %v2629_v5 = vadd.f32 1e-12, %v2627_v17 }
0x127d   :  { %3591 = vrsqrt.f32 %v2629_v5  ;;  %v3507_v5 = vld [vmem:[%s4384_s16 + $0x8] sm:$0xff]  }
0x1286   :  { %v3590_v7 = vpop.eup %3589 }
0x1287   :  { %v2632_v13 = vmul.f32 %v3590_v7, %v2616_v0  ;;  %v3508_v7 = vld [vmem:[%s4384_s16] sm:$0xff]  }
0x1289   :  { %v2640_v55 = vmul.f32 %v3030_v32, %v2632_v13 }
0x128a   :  { %v3592_v18 = vpop.eup %3591 }
0x128b   :  { %v2633_v19 = vmul.f32 %v3592_v18, %v2617_v3  ;;  %v2648_v20 = vadd.f32 %v3031_v10, %v2640_v55 }
0x128d   :  { %v2641_v62 = vmul.f32 %v3030_v32, %v2633_v19 }
0x128f   :  { %v2649_v21 = vadd.f32 %v3031_v10, %v2641_v62 }
0x1291   :  { %v2650_v22 = vpack.c.bf16 %v2649_v21, %v2648_v20 }
0x1293   :  { %3392 = vmatmul.mubr.msk.bf16.vlgmr.msra.gmra.mxu1 %vm65_vm0, %v2650_v22  ;;  %v3042_v22 = vld [vmem:[%s4382_s14 + $0x1] ss:$0 sm:$0xff]  ;;  %s3634_s14 = smov [#allocation2]  }
0x1294   :  { %3411 = vmatprep.mubr.msk.bf16.mxu1 %vm3624_vm1, %v3623_v15  ;;  %3408 = vmatpush3.bf16.msra.mxu1 %v3507_v5  ;;  %s2930_s25 = sshll.u32 %s3634_s14, 4  ;;  %s2931_s25 = int_to_ptr.vmem [resolvable:$true] %s2930_s25 }
0x1295   :  { %3409 = vmatprep.subr.bf16.mxu1 %v3623_v15  ;;  %v3043_v15 = vld [vmem:[%s4383_s15 + $0x1] ss:$0 sm:$0xff]  ;;  %s3601_s15 = scalar_lea.vmem %s2931_s25, 32  ;;  %p3606_p1 = scmp.lt.s32.totalorder %s2931_s25, %s2931_s25 }
0x1296   :  { %p3602_p0 = scmp.ne.s32.totalorder %s2931_s25, %s3601_s15  ;;  %p3607_p2 = scmp.lt.s32.totalorder %s3601_s15, %s3601_s15 }
0x1298   :  { %3410 = vmatpush3.bf16.msra.mxu1 %v3508_v7  ;;  %p3608_p3 = por %p3607_p2, %p3606_p1 }
0x129a   :  { %p3609_p4 = pnand %p3608_p3, %p3602_p0 }
0x1353   :  { %v2706_v28 = vpop.f32.mrf.mxu1 }
0x1354   :  { %v2707_v34 = vadd.f32 %v3032_v27, %v2706_v28 }
0x1355   :  { %v3393_v30 = vpop.f32.mrf.mxu1 }
0x1356   :  { %v2715_v33 = vmul.f32 0.044715, %v2707_v34  ;;  %v2713_v42 = vmul.f32 0.5, %v2707_v34 }
0x1357   :  { %v2709_v12 = vpop.f32.mrf.mxu1 }
0x1358   :  { %v2717_v35 = vmul.f32 %v2715_v33, %v2707_v34  ;;  %v2710_v37 = vadd.f32 %v3032_v27, %v2709_v12  ;;  %v3044_v33 = vld [vmem:[%s4385_s17] ss:$0 sm:$0xff] }
0x1359   :  { %v3394_v38 = vpop.f32.mrf.mxu1 }
0x135a   :  { %v2719_v40 = vmul.f32 %v2717_v35, %v2707_v34  ;;  %v2716_v41 = vmul.f32 0.044715, %v2710_v37  ;;  %v2714_v51 = vmul.f32 0.5, %v2710_v37 }
0x135c   :  { %v2721_v56 = vadd.f32 %v2719_v40, %v2707_v34  ;;  %v2718_v53 = vmul.f32 %v2716_v41, %v2710_v37 }
0x135e   :  { %v2723_v57 = vmul.f32 0.7978846, %v2721_v56  ;;  %v2720_v29 = vmul.f32 %v2718_v53, %v2710_v37 }
0x1360   :  { %3593 = vtanh.f32 %v2723_v57  ;;  %v2722_v39 = vadd.f32 %v2720_v29, %v2710_v37 }
0x1362   :  { %v2724_v44 = vmul.f32 0.7978846, %v2722_v39 }
0x1364   :  { %3595 = vtanh.f32 %v2724_v44 }
0x136d   :  { %v3594_v61 = vpop.eup %3593 }
0x136e   :  { %v2727_v47 = vadd.f32 1.0, %v3594_v61 }
0x1370   :  { %v2729_v48 = vmul.f32 %v2727_v47, %v2713_v42 }
0x1371   :  { %v3596_v50 = vpop.eup %3595 }
0x1372   :  { %v2728_v36 = vadd.f32 1.0, %v3596_v50 }
0x1374   :  { %v2730_v49 = vmul.f32 %v2728_v36, %v2714_v51 }
0x1376   :  { %v2731_v52 = vpack.c.bf16 %v2730_v49, %v2729_v48 }
0x1378   :  { %3404 = vmatmul.mubr.msk.bf16.vlgmr.msra.gmra.mxu0 %vm1405_vm6, %v2731_v52 }
0x1438   :  { %v2799_v6 = vpop.f32.mrf.mxu0 }
0x1439   :  { %v2800_v43 = vadd.f32 %v3036_v58, %v2799_v6 }
0x143a   :  { %v3405_v54 = vpop.f32.mrf.mxu0 }
0x143b   :  { %v2806_v59 = vadd.f32 %v2800_v43, %v2648_v20 }
0x143c   :  { %v2802_v60 = vpop.f32.mrf.mxu0 }
0x143d   :  { %v2803_v0 = vadd.f32 %v3036_v58, %v2802_v60  ;;  %v2808_v1 = vsel %vm65_vm0, %v2806_v59, 0.0 }
0x143e   :  { %2809 = vadd.xlane.f32.xlu1 %v2808_v1  ;;  %v3406_v2 = vpop.f32.mrf.mxu0 }
0x143f   :  { %v2807_v63 = vadd.f32 %v2803_v0, %v2649_v21 }
0x1441   :  { %v2811_v3 = vsel %vm65_vm0, %v2807_v63, 0.0 }
0x1442   :  { %2812 = vadd.xlane.f32.xlu0 %v2811_v3 }
0x14c7   :  { %v2810_v45 = vpop.xlane.xlu1 %2809 }
0x14c8   :  { %v2814_v4 = vmul.f32 0.03125, %v2810_v45 }
0x14ca   :  { %v2816_v8 = vsub.f32 %v2806_v59, %v2814_v4 }
0x14cb   :  { %v2813_v46 = vpop.xlane.xlu0 %2812 }
0x14cc   :  { %v2815_v9 = vmul.f32 0.03125, %v2813_v46  ;;  %v2818_v11 = vmul.f32 %v2816_v8, %v2816_v8 }
0x14ce   :  { %v2817_v14 = vsub.f32 %v2807_v63, %v2815_v9  ;;  %v2820_v31 = vsel %vm65_vm0, %v2818_v11, 0.0 }
0x14cf   :  { %2821 = vadd.xlane.f32.xlu1 %v2820_v31 }
0x14d0   :  { %v2819_v16 = vmul.f32 %v2817_v14, %v2817_v14 }
0x14d2   :  { %v2823_v17 = vsel %vm65_vm0, %v2819_v16, 0.0 }
0x14d3   :  { %2824 = vadd.xlane.f32.xlu0 %v2823_v17 }
0x1558   :  { %v2822_v13 = vpop.xlane.xlu1 %2821 }
0x1559   :  { %v2826_v32 = vmul.f32 0.03125, %v2822_v13 }
0x155b   :  { %v2828_v18 = vadd.f32 1e-12, %v2826_v32 }
0x155c   :  { %v2825_v19 = vpop.xlane.xlu0 %2824 }
0x155d   :  { %3597 = vrsqrt.f32 %v2828_v18  ;;  %v2827_v55 = vmul.f32 0.03125, %v2825_v19 }
0x155f   :  { %v2829_v10 = vadd.f32 1e-12, %v2827_v55 }
0x1561   :  { %3599 = vrsqrt.f32 %v2829_v10 }
0x156a   :  { %v3598_v62 = vpop.eup %3597 }
0x156b   :  { %v2832_v20 = vmul.f32 %v3598_v62, %v2816_v8 }
0x156d   :  { %v2840_v24 = vmul.f32 %v3042_v22, %v2832_v20 }
0x156e   :  { %v3600_v21 = vpop.eup %3599 }
0x156f   :  { %v2833_v23 = vmul.f32 %v3600_v21, %v2817_v14  ;;  %v2848_v27 = vadd.f32 %v3043_v15, %v2840_v24 }
0x1571   :  { %v2841_v25 = vmul.f32 %v3042_v22, %v2833_v23 }
0x1573   :  { %v2849_v26 = vadd.f32 %v3043_v15, %v2841_v25 }
0x1575   :  { %v2851_v28 = vrot.slane %v2849_v26, 7 }
0x1577   :  { %v2854_v34 = vsel %vm2853_vm7, %v2848_v27, %v2851_v28 }
0x1578   :  { %v2855_v30 = vpack.c.bf16 %v2854_v34, %v2854_v34 }
0x157a   :  { %3412 = vmatmul.mubr.msk.bf16.vlgmr.msra.gmra.mxu1 %vm65_vm0, %v2855_v30 }
0x163a   :  { %v2916_v12 = vpop.f32.mrf.mxu1 }
0x163b   :  { %v2917_v35 = vadd.f32 %v3044_v33, %v2916_v12 }
0x163c   :  { %v3413_v37 = vpop.f32.mrf.mxu1 }
0x163d   :  { %2923 = vst.msk [vmem:[#allocation2] sm:$0x3] %vm2922_vm8, %v2917_v35 }
0x163e   :  { %v2919_v38 = vpop.f32.mrf.mxu1 }
0x163f   :  { %3612 = shalt.err (!%p3609_p4)
}
0x1640   :  { %2933 = dma.vmem_to_hbm [thread:$0]  %s2931_s25, 32, %s4386_s18, [#allocation3]   ;;  %v3414_v40 = vpop.f32.mrf.mxu1 }
0x1641   :  { %3621 = dma.done.wait [#allocation3], 32  }
0x1642   :  { %3622 = vsyncadd [#allocation3], 4294967264 }
0x1643   :  { %2937 = vsyncpa [#allocation3], 1 }

</bundles_post_ra>
